<compile_context>
chip_gen: v5e
topology: v5e:2x2
jax: 0.10.0
libtpu: 0.0.40
codegen_flags: <defaults>
</compile_context>

<pallas_src>
import functools
import math

import jax
import jax.numpy as jnp
from jax import lax
from jax.experimental import pallas as pl
from jax.experimental.pallas import tpu as pltpu

EPS = 1e-6


# ----------------------------------------------------------------------------
# Generation-aware scoped VMEM limit (v5e/v6e: 128 MiB phys, v7x: 64 MiB).
# ----------------------------------------------------------------------------
def _vmem_limit_bytes():
    try:
        cap = int(pltpu.get_tpu_info().vmem_capacity_bytes)
    except Exception:                       # query unavailable -> safe default
        cap = 64 * 1024 * 1024
    limit = min(cap * 3 // 4, 100 * 1024 * 1024)   # leave headroom for Mosaic
    return int(max(limit, 32 * 1024 * 1024))


VMEM_LIMIT = _vmem_limit_bytes()


# ----------------------------------------------------------------------------
# Probe: is single-buffering (pipeline_mode=pl.Buffered(1)) supported?
# Must run eagerly at import time (NOT inside a jit trace).
# ----------------------------------------------------------------------------
def _probe_buffered_one():
    try:
        def k(x_ref, o_ref):
            o_ref[...] = x_ref[...] * 2.0

        out = pl.pallas_call(
            k,
            out_shape=jax.ShapeDtypeStruct((16, 128), jnp.float32),
            grid=(2,),
            in_specs=[pl.BlockSpec((8, 128), lambda i: (0, 0),
                                   pipeline_mode=pl.Buffered(1))],
            out_specs=pl.BlockSpec((8, 128), lambda i: (i, 0)),
        )(jnp.zeros((8, 128), jnp.float32))
        jax.block_until_ready(out)
        return True
    except Exception:
        return False


BUFFERED_ONE_OK = _probe_buffered_one()


def _const_spec(block_shape, n_grid):
    """BlockSpec for a grid-invariant operand (constant index_map); single-
    buffered when supported so constant weights don't burn 2x VMEM."""
    zeros = (0,) * len(block_shape)
    if n_grid == 1:
        imap = lambda i: zeros
    elif n_grid == 2:
        imap = lambda i, j: zeros
    else:
        imap = lambda i, j, k: zeros
    if BUFFERED_ONE_OK:
        return pl.BlockSpec(block_shape, imap, pipeline_mode=pl.Buffered(1))
    return pl.BlockSpec(block_shape, imap)


# ----------------------------------------------------------------------------
# Tile-size helpers (blocks stay (8,128)-legal and evenly dividing)
# ----------------------------------------------------------------------------
def _row_tile(m, pref=512):
    """Largest multiple-of-8 tile <= pref dividing m with >=2 blocks (so both
    v7x TensorCores get work); falls back to the full dimension."""
    if m % 8 == 0:
        t = (min(pref, m) // 8) * 8
        while t >= 8:
            if m % t == 0 and m // t >= 2:
                return t
            t -= 8
    return m


def _lane_tile(d, pref=512):
    """Largest multiple-of-128 tile <= pref dividing d, else the full dim."""
    t = (min(pref, d) // 128) * 128
    while t >= 128:
        if d % t == 0:
            return t
        t -= 128
    return d


# ----------------------------------------------------------------------------
# In-kernel math helpers
# ----------------------------------------------------------------------------
def _ln(x, a, b):
    """PyTorch-reference LayerNorm: unbiased std (D-1), eps added to std."""
    d = x.shape[-1]
    mean = jnp.mean(x, axis=-1, keepdims=True)
    diff = x - mean
    var_unbiased = jnp.sum(diff * diff, axis=-1, keepdims=True) * (1.0 / (d - 1))
    std = jnp.sqrt(var_unbiased)
    return a * diff / (std + EPS) + b


# ----------------------------------------------------------------------------
# Pallas kernels
# ----------------------------------------------------------------------------
def layernorm_kernel(x_ref, a_ref, b_ref, o_ref):
    o_ref[...] = _ln(x_ref[...], a_ref[...], b_ref[...]).astype(o_ref.dtype)


def ln_qkv_kernel(x_ref, a_ref, b_ref, w_ref, bias_ref,
                  q_ref, k_ref, v_ref, xn_ref, *, dk):
    """Fused pre-norm + per-head QKV projection.

    grid = (row_tiles, heads), heads innermost.  x stays resident across the
    head axis; the LN result is computed once per row tile into xn_ref.
    Weight layout: (H, D, 3*dk) resident in VMEM (single-buffered); one MXU
    dot of width 3*dk per step; outputs are written head-major (H, M, dk) so
    attention never has to slice sub-128-lane head chunks."""
    h = pl.program_id(1)

    @pl.when(h == 0)
    def _compute_ln():
        xn_ref[...] = _ln(x_ref[...], a_ref[...], b_ref[...])

    qkv = (jnp.dot(xn_ref[...], w_ref[h], preferred_element_type=jnp.float32)
           + bias_ref[h])                                   # (tm, 3*dk)
    q_ref[0] = qkv[:, :dk].astype(q_ref.dtype)              # q pre-scaled at pack time
    k_ref[0] = qkv[:, dk:2 * dk].astype(k_ref.dtype)
    v_ref[0] = qkv[:, 2 * dk:].astype(v_ref.dtype)


def attention_kernel(q_ref, k_ref, v_ref, bias_ref, o_ref):
    """One (batch, head) pair per grid step; full-extent (S, dk) blocks, one
    dense context store.  1/sqrt(dk) is already folded into Wq/bq."""
    q = q_ref[0]                            # (S, dk), already scaled
    k = k_ref[0]                            # (S, dk)
    v = v_ref[0]                            # (S, dk)
    s = lax.dot_general(q, k, (((1,), (1,)), ((), ())),
                        preferred_element_type=jnp.float32)  # (S, S) = q @ k^T
    s = s + bias_ref[0]                     # additive mask: 0 keep / -1e9 masked
    s = s - jnp.max(s, axis=-1, keepdims=True)
    p = jnp.exp(s)
    p = p * pl.reciprocal(jnp.sum(p, axis=-1, keepdims=True), approx=False)
    o_ref[0] = jnp.dot(p, v, preferred_element_type=jnp.float32).astype(o_ref.dtype)


def out_proj_kernel(ctx_ref, w_ref, b_ref, res_ref, o_ref, acc_ref):
    """y = concat_h(ctx_h) @ Wo^T + bo + residual, with heads as the reduction
    grid axis (consumes head-major ctx with no relayout)."""
    h = pl.program_id(2)

    @pl.when(h == 0)
    def _init():
        acc_ref[...] = jnp.zeros_like(acc_ref)

    acc_ref[...] += jnp.dot(ctx_ref[0], w_ref[0],
                            preferred_element_type=jnp.float32)

    @pl.when(h == pl.num_programs(2) - 1)
    def _finalize():
        o_ref[...] = (acc_ref[...] + b_ref[...] + res_ref[...]).astype(o_ref.dtype)


def ln_ffn_kernel(x_ref, a_ref, b_ref, w1_ref, b1_ref, w2_ref, b2_ref,
                  o_ref, xn_ref, acc_ref):
    """Fused pre-norm + FFN + residual, tiled over d_ff:
    out = x + sum_f relu(LN(x) @ W1t[:, f] + b1[f]) @ W2t[f, :] + b2."""
    f = pl.program_id(1)

    @pl.when(f == 0)
    def _init():
        xn_ref[...] = _ln(x_ref[...], a_ref[...], b_ref[...])
        acc_ref[...] = jnp.zeros_like(acc_ref)

    hmid = (jnp.dot(xn_ref[...], w1_ref[...], preferred_element_type=jnp.float32)
            + b1_ref[...])
    hmid = jnp.maximum(hmid, 0.0)
    acc_ref[...] += jnp.dot(hmid, w2_ref[...], preferred_element_type=jnp.float32)

    @pl.when(f == pl.num_programs(1) - 1)
    def _finalize():
        o_ref[...] = (x_ref[...] + acc_ref[...] + b2_ref[...]).astype(o_ref.dtype)


# ----------------------------------------------------------------------------
# pallas_call wrappers
# ----------------------------------------------------------------------------
def layernorm(x2d, a2, b2):
    M, D = x2d.shape
    tm = _row_tile(M)
    return pl.pallas_call(
        layernorm_kernel,
        out_shape=jax.ShapeDtypeStruct((M, D), x2d.dtype),
        grid=(M // tm,),
        in_specs=[pl.BlockSpec((tm, D), lambda i: (i, 0)),
                  _const_spec((1, D), 1),
                  _const_spec((1, D), 1)],
        out_specs=pl.BlockSpec((tm, D), lambda i: (i, 0)),
        compiler_params=pltpu.CompilerParams(
            dimension_semantics=("parallel",),
            vmem_limit_bytes=VMEM_LIMIT),
    )(x2d, a2, b2)


def ln_qkv(x2d, ln_a, ln_b, wqkv, bqkv, *, n_heads):
    M, D = x2d.shape
    dk = wqkv.shape[-1] // 3
    tm = _row_tile(M)
    head_out = pl.BlockSpec((1, tm, dk), lambda i, h: (h, i, 0))
    out = jax.ShapeDtypeStruct((n_heads, M, dk), x2d.dtype)
    return pl.pallas_call(
        functools.partial(ln_qkv_kernel, dk=dk),
        out_shape=(out, out, out),
        grid=(M // tm, n_heads),
        in_specs=[pl.BlockSpec((tm, D), lambda i, h: (i, 0)),
                  _const_spec((1, D), 2),
                  _const_spec((1, D), 2),
                  _const_spec((n_heads, D, 3 * dk), 2),
                  _const_spec((n_heads, 1, 3 * dk), 2)],
        out_specs=(head_out, head_out, head_out),
        scratch_shapes=[pltpu.VMEM((tm, D), jnp.float32)],
        compiler_params=pltpu.CompilerParams(
            dimension_semantics=("parallel", "arbitrary"),
            vmem_limit_bytes=VMEM_LIMIT),
    )(x2d, ln_a, ln_b, wqkv, bqkv)


def attention(q, k, v, bias, seq_len):
    # q/k/v: (H, B*S, dk) head-major; bias: (B, 1, S) additive (0 / -1e9).
    H, M, dk = q.shape
    B = M // seq_len
    blk = pl.BlockSpec((1, seq_len, dk), lambda b, h: (h, b, 0))
    return pl.pallas_call(
        attention_kernel,
        out_shape=jax.ShapeDtypeStruct((H, M, dk), q.dtype),
        grid=(B, H),
        in_specs=[blk, blk, blk,
                  pl.BlockSpec((1, 1, seq_len), lambda b, h: (b, 0, 0))],
        out_specs=blk,
        compiler_params=pltpu.CompilerParams(
            dimension_semantics=("parallel", "parallel"),
            vmem_limit_bytes=VMEM_LIMIT),
    )(q, k, v, bias)


def out_proj_residual(ctx, wo, bo, res2d):
    # ctx: (H, M, dk); wo: (H, dk, D) head-major pre-transposed; bo: (1, D).
    H, M, dk = ctx.shape
    D = wo.shape[-1]
    tm = _row_tile(M, 256)
    tn = _lane_tile(D, 256)
    return pl.pallas_call(
        out_proj_kernel,
        out_shape=jax.ShapeDtypeStruct((M, D), res2d.dtype),
        grid=(M // tm, D // tn, H),
        in_specs=[pl.BlockSpec((1, tm, dk), lambda i, j, h: (h, i, 0)),
                  pl.BlockSpec((1, dk, tn), lambda i, j, h: (h, 0, j)),
                  pl.BlockSpec((1, tn), lambda i, j, h: (0, j)),
                  pl.BlockSpec((tm, tn), lambda i, j, h: (i, j))],
        out_specs=pl.BlockSpec((tm, tn), lambda i, j, h: (i, j)),
        scratch_shapes=[pltpu.VMEM((tm, tn), jnp.float32)],
        compiler_params=pltpu.CompilerParams(
            dimension_semantics=("parallel", "parallel", "arbitrary"),
            vmem_limit_bytes=VMEM_LIMIT),
    )(ctx, wo, bo, res2d)


def ln_ffn_residual(x2d, ln_a, ln_b, w1t, b1, w2t, b2):
    # w1t: (D, F) = W1^T; w2t: (F, D) = W2^T (pre-transposed once at pack time).
    M, D = x2d.shape
    F = w1t.shape[1]
    tm = _row_tile(M)
    tf = _lane_tile(F, 512)
    return pl.pallas_call(
        ln_ffn_kernel,
        out_shape=jax.ShapeDtypeStruct((M, D), x2d.dtype),
        grid=(M // tm, F // tf),
        in_specs=[pl.BlockSpec((tm, D), lambda i, f: (i, 0)),
                  _const_spec((1, D), 2),
                  _const_spec((1, D), 2),
                  pl.BlockSpec((D, tf), lambda i, f: (0, f)),
                  pl.BlockSpec((1, tf), lambda i, f: (0, f)),
                  pl.BlockSpec((tf, D), lambda i, f: (f, 0)),
                  _const_spec((1, D), 2)],
        out_specs=pl.BlockSpec((tm, D), lambda i, f: (i, 0)),
        scratch_shapes=[pltpu.VMEM((tm, D), jnp.float32),
                        pltpu.VMEM((tm, D), jnp.float32)],
        compiler_params=pltpu.CompilerParams(
            dimension_semantics=("parallel", "arbitrary"),
            vmem_limit_bytes=VMEM_LIMIT),
    )(x2d, ln_a, ln_b, w1t, b1, w2t, b2)


# ----------------------------------------------------------------------------
# Model composition
# ----------------------------------------------------------------------------
def encoder_layer(p, x2d, bias, seq_len, n_heads):
    # Sublayer 0: x + Wo(self_attn(LN(x)))  — LN fused into QKV, residual
    # fused into the output-projection epilogue (heads = reduction axis).
    q, k, v = ln_qkv(x2d, p["ln1_a"], p["ln1_b"], p["wqkv"], p["bqkv"],
                     n_heads=n_heads)
    ctx = attention(q, k, v, bias, seq_len)               # (H, B*S, dk)
    x2d = out_proj_residual(ctx, p["wo"], p["bo"], x2d)
    # Sublayer 1: x + FFN(LN(x)) — fused, tiled over d_ff.
    return ln_ffn_residual(x2d, p["ln2_a"], p["ln2_b"],
                           p["w1"], p["b1"], p["w2"], p["b2"])


@functools.partial(jax.jit, static_argnames=("n_heads",))
def encoder_forward(params, x, mask, n_heads):
    B, S, D = x.shape
    # masked_fill(mask==0, -1e9)  →  additive bias (0 keep / -1e9 masked key).
    bias = (1.0 - mask.astype(jnp.float32)).reshape(B, 1, S) * jnp.float32(-1e9)
    x2d = x.reshape(B * S, D)
    for layer_p in params["layers"]:
        x2d = encoder_layer(layer_p, x2d, bias, S, n_heads)
    return layernorm(x2d, params["norm_a"], params["norm_b"]).reshape(B, S, D)


# ----------------------------------------------------------------------------
# One-time parameter repacking (PyTorch layout in, kernel layout out).
# No transposes ever happen inside the forward pass.
# ----------------------------------------------------------------------------
def pack_params(raw, n_heads):
    def pack_layer(p):
        D = p["ln1_a"].shape[0]
        dk = D // n_heads
        scale = 1.0 / math.sqrt(dk)
        a = p["attn"]

        def head_major(w):                     # (out,in) -> (H, in, dk)
            return jnp.transpose(w.T.reshape(D, n_heads, dk), (1, 0, 2))

        wq_h = head_major(a["wq"]) * scale     # fold 1/sqrt(dk) into Wq
        wk_h = head_major(a["wk"])
        wv_h = head_major(a["wv"])
        wqkv = jnp.concatenate([wq_h, wk_h, wv_h], axis=-1)     # (H, D, 3*dk)
        bqkv = jnp.concatenate([(a["bq"] * scale).reshape(n_heads, 1, dk),
                                a["bk"].reshape(n_heads, 1, dk),
                                a["bv"].reshape(n_heads, 1, dk)], axis=-1)
        wo = a["wo"].T.reshape(n_heads, dk, D)                  # (H, dk, D)
        F = p["w1"].shape[0]
        return {
            "ln1_a": p["ln1_a"].reshape(1, D), "ln1_b": p["ln1_b"].reshape(1, D),
            "wqkv": wqkv, "bqkv": bqkv,
            "wo": wo, "bo": a["bo"].reshape(1, D),
            "ln2_a": p["ln2_a"].reshape(1, D), "ln2_b": p["ln2_b"].reshape(1, D),
            "w1": p["w1"].T, "b1": p["b1"].reshape(1, F),        # (D, F)
            "w2": p["w2"].T, "b2": p["b2"].reshape(1, D),        # (F, D)
        }

    D = raw["norm_a"].shape[0]
    return {"layers": [pack_layer(p) for p in raw["layers"]],
            "norm_a": raw["norm_a"].reshape(1, D),
            "norm_b": raw["norm_b"].reshape(1, D)}


# ----------------------------------------------------------------------------
# Deterministic parameter construction (PyTorch conventions) + JAX reference
# ----------------------------------------------------------------------------
def init_params(key, d_model, d_ff, n_layers):
    def dense(k, out_f, in_f):
        kw, kb = jax.random.split(k)
        s = 1.0 / math.sqrt(in_f)
        w = jax.random.uniform(kw, (out_f, in_f), jnp.float32, -s, s)
        b = jax.random.uniform(kb, (out_f,), jnp.float32, -s, s)
        return w, b

    keys = jax.random.split(key, 8)
    wq, bq = dense(keys[0], d_model, d_model)
    wk, bk = dense(keys[1], d_model, d_model)
    wv, bv = dense(keys[2], d_model, d_model)
    wo, bo = dense(keys[3], d_model, d_model)
    w1, b1 = dense(keys[4], d_ff, d_model)
    w2, b2 = dense(keys[5], d_model, d_ff)

    layer_p = {
        "attn": {"wq": wq, "bq": bq, "wk": wk, "bk": bk,
                 "wv": wv, "bv": bv, "wo": wo, "bo": bo},
        "w1": w1, "b1": b1, "w2": w2, "b2": b2,
        "ln1_a": jnp.ones((d_model,), jnp.float32),
        "ln1_b": jnp.zeros((d_model,), jnp.float32),
        "ln2_a": jnp.ones((d_model,), jnp.float32),
        "ln2_b": jnp.zeros((d_model,), jnp.float32),
    }
    # clones() deep-copies one layer N times -> identical initial params.
    return {"layers": [layer_p for _ in range(n_layers)],
            "norm_a": jnp.ones((d_model,), jnp.float32),
            "norm_b": jnp.zeros((d_model,), jnp.float32)}


def _reference_forward(raw, x, mask, n_heads):
    """Pure-JAX re-implementation of the PyTorch Encoder (eval mode)."""
    def ln(t, a, b):
        mean = t.mean(-1, keepdims=True)
        var = ((t - mean) ** 2).sum(-1, keepdims=True) / (t.shape[-1] - 1)
        return a * (t - mean) / (jnp.sqrt(var) + EPS) + b

    B, S, D = x.shape
    dk = D // n_heads
    for p in raw["layers"]:
        a = p["attn"]
        xn = ln(x, p["ln1_a"], p["ln1_b"])
        q = xn @ a["wq"].T + a["bq"]
        k = xn @ a["wk"].T + a["bk"]
        v = xn @ a["wv"].T + a["bv"]
        split = lambda t: t.reshape(B, S, n_heads, dk).transpose(0, 2, 1, 3)
        qh, kh, vh = split(q), split(k), split(v)
        scores = jnp.einsum("bhqd,bhkd->bhqk", qh, kh) / math.sqrt(dk)
        scores = jnp.where(mask[:, None, :, :] == 0, -1e9, scores)
        p_att = jax.nn.softmax(scores, axis=-1)
        ctx = jnp.einsum("bhqk,bhkd->bhqd", p_att, vh)
        ctx = ctx.transpose(0, 2, 1, 3).reshape(B, S, D)
        x = x + ctx @ a["wo"].T + a["bo"]
        xn2 = ln(x, p["ln2_a"], p["ln2_b"])
        hmid = jax.nn.relu(xn2 @ p["w1"].T + p["b1"])
        x = x + hmid @ p["w2"].T + p["b2"]
    return ln(x, raw["norm_a"], raw["norm_b"])


# ----------------------------------------------------------------------------
if __name__ == "__main__":
    B, S, D, H, D_FF, N_LAYERS = 2, 8, 32, 4, 64, 2

    key = jax.random.PRNGKey(0)
    k_params, k_x = jax.random.split(key)

    raw_params = init_params(k_params, D, D_FF, N_LAYERS)
    params = pack_params(raw_params, H)            # one-time repack, no
                                                   # per-forward transposes
    x = jax.random.normal(k_x, (B, S, D), jnp.float32)

    # Source mask, shape (B, 1, S): 1 = attend, 0 = masked key position.
    mask = jnp.ones((B, 1, S), jnp.float32)
    mask = mask.at[1, 0, S - 2:].set(0.0)

    out = encoder_forward(params, x, mask, n_heads=H)
    jax.block_until_ready(out)
    assert out.shape == (B, S, D)

    ref = _reference_forward(raw_params, x, mask, H)
    err = float(jnp.max(jnp.abs(out - ref)))
    assert err < 1e-3, f"mismatch vs reference: max abs err {err}"

    print("KERNEL_OK")
</pallas_src>

<mosaic_0001>
module attributes {stable_mosaic.version = 11 : i64} {
  func.func @k(%arg0: i32, %arg1: memref<8x128xf32, #tpu.memory_space<vmem>>, %arg2: memref<8x128xf32, #tpu.memory_space<vmem>>) attributes {dimension_semantics = [#tpu.dimension_semantics<arbitrary>], iteration_bounds = array<i64: 2>, scalar_prefetch = 0 : i64, scratch_operands = 0 : i64, tpu.core_type = #tpu.core_type<tc>, window_params = [{pipeline_mode = #tpu.pipeline_mode<synchronous>, transform_indices = @transform_0, window_bounds = array<i64: 8, 128>}, {transform_indices = @transform_1, window_bounds = array<i64: 8, 128>}]} {
    %c0 = arith.constant 0 : index
    %c0_0 = arith.constant 0 : index
    %0 = vector.load %arg1[%c0, %c0_0] : memref<8x128xf32, #tpu.memory_space<vmem>>, vector<8x128xf32>
    %cst = arith.constant 2.000000e+00 : f32
    %1 = vector.broadcast %cst : f32 to vector<8x128xf32>
    %2 = arith.mulf %0, %1 : vector<8x128xf32>
    %c0_1 = arith.constant 0 : index
    %c0_2 = arith.constant 0 : index
    %3 = vector.load %arg2[%c0_1, %c0_2] : memref<8x128xf32, #tpu.memory_space<vmem>>, vector<8x128xf32>
    tpu.vector_store %arg2[%c0_1, %c0_2], %2 {strides = array<i32>} : memref<8x128xf32, #tpu.memory_space<vmem>>, vector<8x128xf32>,
    return
  }
  func.func @transform_0(%arg0: i32) -> (i32, i32) {
    %c0_i32 = arith.constant 0 : i32
    %c0_i32_0 = arith.constant 0 : i32
    %c0_i32_1 = arith.constant 0 : i32
    return %c0_i32, %c0_i32_0 : i32, i32
  }
  func.func @transform_1(%arg0: i32) -> (i32, i32) {
    %c0_i32 = arith.constant 0 : i32
    %c0_i32_0 = arith.constant 0 : i32
    return %arg0, %c0_i32 : i32, i32
  }
}

module attributes {stable_mosaic.version = 11 : i64} {
  func.func @attention_kernel(%arg0: i32, %arg1: i32, %arg2: memref<1x8x8xf32, #tpu.memory_space<vmem>>, %arg3: memref<1x8x8xf32, #tpu.memory_space<vmem>>, %arg4: memref<1x8x8xf32, #tpu.memory_space<vmem>>, %arg5: memref<1x1x8xf32, #tpu.memory_space<vmem>>, %arg6: memref<1x8x8xf32, #tpu.memory_space<vmem>>) attributes {dimension_semantics = [#tpu.dimension_semantics<parallel>, #tpu.dimension_semantics<parallel>], iteration_bounds = array<i64: 2, 4>, scalar_prefetch = 0 : i64, scratch_operands = 0 : i64, tpu.core_type = #tpu.core_type<tc>, window_params = [{transform_indices = @transform_0, window_bounds = array<i64: 1, 8, 8>}, {transform_indices = @transform_1, window_bounds = array<i64: 1, 8, 8>}, {transform_indices = @transform_2, window_bounds = array<i64: 1, 8, 8>}, {transform_indices = @transform_3, window_bounds = array<i64: 1, 1, 8>}, {transform_indices = @transform_4, window_bounds = array<i64: 1, 8, 8>}]} {
    %c0 = arith.constant 0 : index
    %c0_0 = arith.constant 0 : index
    %c0_1 = arith.constant 0 : index
    %0 = vector.load %arg2[%c0, %c0_0, %c0_1] : memref<1x8x8xf32, #tpu.memory_space<vmem>>, vector<1x8x8xf32>
    %1 = vector.shape_cast %0 : vector<1x8x8xf32> to vector<8x8xf32>
    %c0_2 = arith.constant 0 : index
    %c0_3 = arith.constant 0 : index
    %c0_4 = arith.constant 0 : index
    %2 = vector.load %arg3[%c0_2, %c0_3, %c0_4] : memref<1x8x8xf32, #tpu.memory_space<vmem>>, vector<1x8x8xf32>
    %3 = vector.shape_cast %2 : vector<1x8x8xf32> to vector<8x8xf32>
    %c0_5 = arith.constant 0 : index
    %c0_6 = arith.constant 0 : index
    %c0_7 = arith.constant 0 : index
    %4 = vector.load %arg4[%c0_5, %c0_6, %c0_7] : memref<1x8x8xf32, #tpu.memory_space<vmem>>, vector<1x8x8xf32>
    %5 = vector.shape_cast %4 : vector<1x8x8xf32> to vector<8x8xf32>
    %cst = arith.constant dense<0.000000e+00> : vector<8x8xf32>
    %6 = tpu.matmul %1, %3, %cst {dimension_numbers = #tpu.dot_dimension_numbers<[1], [1], [0], [0], [0, 0, 1, 0], [], []>} : vector<8x8xf32>, vector<8x8xf32>, vector<8x8xf32> -> vector<8x8xf32>
    %c0_8 = arith.constant 0 : index
    %c0_9 = arith.constant 0 : index
    %c0_10 = arith.constant 0 : index
    %7 = vector.load %arg5[%c0_8, %c0_9, %c0_10] : memref<1x1x8xf32, #tpu.memory_space<vmem>>, vector<1x1x8xf32>
    %8 = vector.shape_cast %7 : vector<1x1x8xf32> to vector<1x8xf32>
    %9 = vector.broadcast %8 : vector<1x8xf32> to vector<8x8xf32>
    %10 = arith.addf %6, %9 : vector<8x8xf32>
    %cst_11 = arith.constant dense<0xFF800000> : vector<8xf32>
    %11 = vector.multi_reduction <maximumf>, %10, %cst_11 [1] : vector<8x8xf32> to vector<8xf32>
    %12 = vector.shape_cast %11 : vector<8xf32> to vector<8x1xf32>
    %13 = vector.broadcast %12 : vector<8x1xf32> to vector<8x8xf32>
    %14 = arith.subf %10, %13 : vector<8x8xf32>
    %15 = math.exp %14 : vector<8x8xf32>
    %cst_12 = arith.constant dense<0.000000e+00> : vector<8xf32>
    %16 = vector.multi_reduction <add>, %15, %cst_12 [1] : vector<8x8xf32> to vector<8xf32>
    %17 = vector.shape_cast %16 : vector<8xf32> to vector<8x1xf32>
    %18 = tpu.reciprocal %17 : vector<8x1xf32> -> vector<8x1xf32>
    %19 = vector.broadcast %18 : vector<8x1xf32> to vector<8x8xf32>
    %20 = arith.mulf %15, %19 : vector<8x8xf32>
    %cst_13 = arith.constant dense<0.000000e+00> : vector<8x8xf32>
    %21 = tpu.matmul %20, %5, %cst_13 {dimension_numbers = #tpu.dot_dimension_numbers<[1], [0], [0], [1], [0, 0, 1, 1], [], []>} : vector<8x8xf32>, vector<8x8xf32>, vector<8x8xf32> -> vector<8x8xf32>
    %c0_14 = arith.constant 0 : index
    %c0_15 = arith.constant 0 : index
    %c0_16 = arith.constant 0 : index
    %22 = vector.load %arg6[%c0_14, %c0_15, %c0_16] : memref<1x8x8xf32, #tpu.memory_space<vmem>>, vector<1x8x8xf32>
    %23 = vector.shape_cast %22 : vector<1x8x8xf32> to vector<8x8xf32>
    %24 = vector.shape_cast %21 : vector<8x8xf32> to vector<1x8x8xf32>
    tpu.vector_store %arg6[%c0_14, %c0_15, %c0_16], %24 {strides = array<i32>} : memref<1x8x8xf32, #tpu.memory_space<vmem>>, vector<1x8x8xf32>,
    return
  }
  func.func @transform_0(%arg0: i32, %arg1: i32) -> (i32, i32, i32) {
    %c0_i32 = arith.constant 0 : i32
    %c0_i32_0 = arith.constant 0 : i32
    return %arg1, %arg0, %c0_i32 : i32, i32, i32
  }
  func.func @transform_1(%arg0: i32, %arg1: i32) -> (i32, i32, i32) {
    %c0_i32 = arith.constant 0 : i32
    %c0_i32_0 = arith.constant 0 : i32
    return %arg1, %arg0, %c0_i32 : i32, i32, i32
  }
  func.func @transform_2(%arg0: i32, %arg1: i32) -> (i32, i32, i32) {
    %c0_i32 = arith.constant 0 : i32
    %c0_i32_0 = arith.constant 0 : i32
    return %arg1, %arg0, %c0_i32 : i32, i32, i32
  }
  func.func @transform_3(%arg0: i32, %arg1: i32) -> (i32, i32, i32) {
    %c0_i32 = arith.constant 0 : i32
    %c0_i32_0 = arith.constant 0 : i32
    %c0_i32_1 = arith.constant 0 : i32
    return %arg0, %c0_i32, %c0_i32_0 : i32, i32, i32
  }
  func.func @transform_4(%arg0: i32, %arg1: i32) -> (i32, i32, i32) {
    %c0_i32 = arith.constant 0 : i32
    %c0_i32_0 = arith.constant 0 : i32
    return %arg1, %arg0, %c0_i32 : i32, i32, i32
  }
}

module attributes {stable_mosaic.version = 11 : i64} {
  func.func @ln_qkv_kernel(%arg0: i32, %arg1: i32, %arg2: memref<8x32xf32, #tpu.memory_space<vmem>>, %arg3: memref<1x32xf32, #tpu.memory_space<vmem>>, %arg4: memref<1x32xf32, #tpu.memory_space<vmem>>, %arg5: memref<4x32x24xf32, #tpu.memory_space<vmem>>, %arg6: memref<4x1x24xf32, #tpu.memory_space<vmem>>, %arg7: memref<1x8x8xf32, #tpu.memory_space<vmem>>, %arg8: memref<1x8x8xf32, #tpu.memory_space<vmem>>, %arg9: memref<1x8x8xf32, #tpu.memory_space<vmem>>, %arg10: memref<8x32xf32, #tpu.memory_space<vmem>>) attributes {dimension_semantics = [#tpu.dimension_semantics<parallel>, #tpu.dimension_semantics<arbitrary>], iteration_bounds = array<i64: 2, 4>, scalar_prefetch = 0 : i64, scratch_operands = 1 : i64, tpu.core_type = #tpu.core_type<tc>, window_params = [{transform_indices = @transform_0, window_bounds = array<i64: 8, 32>}, {pipeline_mode = #tpu.pipeline_mode<synchronous>, transform_indices = @transform_1, window_bounds = array<i64: 1, 32>}, {pipeline_mode = #tpu.pipeline_mode<synchronous>, transform_indices = @transform_2, window_bounds = array<i64: 1, 32>}, {pipeline_mode = #tpu.pipeline_mode<synchronous>, transform_indices = @transform_3, window_bounds = array<i64: 4, 32, 24>}, {pipeline_mode = #tpu.pipeline_mode<synchronous>, transform_indices = @transform_4, window_bounds = array<i64: 4, 1, 24>}, {transform_indices = @transform_5, window_bounds = array<i64: 1, 8, 8>}, {transform_indices = @transform_6, window_bounds = array<i64: 1, 8, 8>}, {transform_indices = @transform_7, window_bounds = array<i64: 1, 8, 8>}]} {
    %c0_i32 = arith.constant 0 : i32
    %0 = arith.cmpi eq, %arg1, %c0_i32 : i32
    %1 = arith.extui %0 : i1 to i32
    %c0_i32_0 = arith.constant 0 : i32
    %2 = arith.cmpi ne, %1, %c0_i32_0 : i32
    scf.if %2 {
      %c0_15 = arith.constant 0 : index
      %c0_16 = arith.constant 0 : index
      %25 = vector.load %arg2[%c0_15, %c0_16] : memref<8x32xf32, #tpu.memory_space<vmem>>, vector<8x32xf32>
      %c0_17 = arith.constant 0 : index
      %c0_18 = arith.constant 0 : index
      %26 = vector.load %arg3[%c0_17, %c0_18] : memref<1x32xf32, #tpu.memory_space<vmem>>, vector<1x32xf32>
      %c0_19 = arith.constant 0 : index
      %c0_20 = arith.constant 0 : index
      %27 = vector.load %arg4[%c0_19, %c0_20] : memref<1x32xf32, #tpu.memory_space<vmem>>, vector<1x32xf32>
      %cst_21 = arith.constant dense<0.000000e+00> : vector<8xf32>
      %28 = vector.multi_reduction <add>, %25, %cst_21 [1] : vector<8x32xf32> to vector<8xf32>
      %29 = vector.shape_cast %28 : vector<8xf32> to vector<8x1xf32>
      %cst_22 = arith.constant 3.200000e+01 : f32
      %30 = vector.broadcast %cst_22 : f32 to vector<8x1xf32>
      %31 = arith.divf %29, %30 : vector<8x1xf32>
      %32 = vector.broadcast %31 : vector<8x1xf32> to vector<8x32xf32>
      %33 = arith.subf %25, %32 : vector<8x32xf32>
      %34 = arith.mulf %33, %33 : vector<8x32xf32>
      %cst_23 = arith.constant dense<0.000000e+00> : vector<8xf32>
      %35 = vector.multi_reduction <add>, %34, %cst_23 [1] : vector<8x32xf32> to vector<8xf32>
      %36 = vector.shape_cast %35 : vector<8xf32> to vector<8x1xf32>
      %cst_24 = arith.constant 0.0322580636 : f32
      %37 = vector.broadcast %cst_24 : f32 to vector<8x1xf32>
      %38 = arith.mulf %36, %37 : vector<8x1xf32>
      %39 = math.sqrt %38 : vector<8x1xf32>
      %40 = vector.broadcast %26 : vector<1x32xf32> to vector<8x32xf32>
      %41 = arith.mulf %40, %33 : vector<8x32xf32>
      %cst_25 = arith.constant 9.99999997E-7 : f32
      %42 = vector.broadcast %cst_25 : f32 to vector<8x1xf32>
      %43 = arith.addf %39, %42 : vector<8x1xf32>
      %44 = vector.broadcast %43 : vector<8x1xf32> to vector<8x32xf32>
      %45 = arith.divf %41, %44 : vector<8x32xf32>
      %46 = vector.broadcast %27 : vector<1x32xf32> to vector<8x32xf32>
      %47 = arith.addf %45, %46 : vector<8x32xf32>
      %c0_26 = arith.constant 0 : index
      %c0_27 = arith.constant 0 : index
      %48 = vector.load %arg10[%c0_26, %c0_27] : memref<8x32xf32, #tpu.memory_space<vmem>>, vector<8x32xf32>
      tpu.vector_store %arg10[%c0_26, %c0_27], %47 {strides = array<i32>} : memref<8x32xf32, #tpu.memory_space<vmem>>, vector<8x32xf32>,
    } else {
    }
    %c0 = arith.constant 0 : index
    %c0_1 = arith.constant 0 : index
    %3 = vector.load %arg10[%c0, %c0_1] : memref<8x32xf32, #tpu.memory_space<vmem>>, vector<8x32xf32>
    %4 = arith.index_cast %arg1 : i32 to index
    %c0_2 = arith.constant 0 : index
    %c0_3 = arith.constant 0 : index
    %5 = vector.load %arg5[%4, %c0_2, %c0_3] : memref<4x32x24xf32, #tpu.memory_space<vmem>>, vector<1x32x24xf32>
    %6 = vector.shape_cast %5 : vector<1x32x24xf32> to vector<32x24xf32>
    %cst = arith.constant dense<0.000000e+00> : vector<8x24xf32>
    %7 = tpu.matmul %3, %6, %cst {dimension_numbers = #tpu.dot_dimension_numbers<[1], [0], [0], [1], [0, 0, 1, 1], [], []>} : vector<8x32xf32>, vector<32x24xf32>, vector<8x24xf32> -> vector<8x24xf32>
    %8 = arith.index_cast %arg1 : i32 to index
    %c0_4 = arith.constant 0 : index
    %c0_5 = arith.constant 0 : index
    %9 = vector.load %arg6[%8, %c0_4, %c0_5] : memref<4x1x24xf32, #tpu.memory_space<vmem>>, vector<1x1x24xf32>
    %10 = vector.shape_cast %9 : vector<1x1x24xf32> to vector<1x24xf32>
    %11 = vector.broadcast %10 : vector<1x24xf32> to vector<8x24xf32>
    %12 = arith.addf %7, %11 : vector<8x24xf32>
    %13 = vector.extract_strided_slice %12 {offsets = [0, 0], sizes = [8, 8], strides = [1, 1]} : vector<8x24xf32> to vector<8x8xf32>
    %c0_6 = arith.constant 0 : index
    %c0_7 = arith.constant 0 : index
    %c0_8 = arith.constant 0 : index
    %14 = vector.load %arg7[%c0_6, %c0_7, %c0_8] : memref<1x8x8xf32, #tpu.memory_space<vmem>>, vector<1x8x8xf32>
    %15 = vector.shape_cast %14 : vector<1x8x8xf32> to vector<8x8xf32>
    %16 = vector.shape_cast %13 : vector<8x8xf32> to vector<1x8x8xf32>
    tpu.vector_store %arg7[%c0_6, %c0_7, %c0_8], %16 {strides = array<i32>} : memref<1x8x8xf32, #tpu.memory_space<vmem>>, vector<1x8x8xf32>,
    %17 = vector.extract_strided_slice %12 {offsets = [0, 8], sizes = [8, 8], strides = [1, 1]} : vector<8x24xf32> to vector<8x8xf32>
    %c0_9 = arith.constant 0 : index
    %c0_10 = arith.constant 0 : index
    %c0_11 = arith.constant 0 : index
    %18 = vector.load %arg8[%c0_9, %c0_10, %c0_11] : memref<1x8x8xf32, #tpu.memory_space<vmem>>, vector<1x8x8xf32>
    %19 = vector.shape_cast %18 : vector<1x8x8xf32> to vector<8x8xf32>
    %20 = vector.shape_cast %17 : vector<8x8xf32> to vector<1x8x8xf32>
    tpu.vector_store %arg8[%c0_9, %c0_10, %c0_11], %20 {strides = array<i32>} : memref<1x8x8xf32, #tpu.memory_space<vmem>>, vector<1x8x8xf32>,
    %21 = vector.extract_strided_slice %12 {offsets = [0, 16], sizes = [8, 8], strides = [1, 1]} : vector<8x24xf32> to vector<8x8xf32>
    %c0_12 = arith.constant 0 : index
    %c0_13 = arith.constant 0 : index
    %c0_14 = arith.constant 0 : index
    %22 = vector.load %arg9[%c0_12, %c0_13, %c0_14] : memref<1x8x8xf32, #tpu.memory_space<vmem>>, vector<1x8x8xf32>
    %23 = vector.shape_cast %22 : vector<1x8x8xf32> to vector<8x8xf32>
    %24 = vector.shape_cast %21 : vector<8x8xf32> to vector<1x8x8xf32>
    tpu.vector_store %arg9[%c0_12, %c0_13, %c0_14], %24 {strides = array<i32>} : memref<1x8x8xf32, #tpu.memory_space<vmem>>, vector<1x8x8xf32>,
    return
  }
  func.func @transform_0(%arg0: i32, %arg1: i32) -> (i32, i32) {
    %c0_i32 = arith.constant 0 : i32
    %c0_i32_0 = arith.constant 0 : i32
    return %arg0, %c0_i32 : i32, i32
  }
  func.func @transform_1(%arg0: i32, %arg1: i32) -> (i32, i32) {
    %c0_i32 = arith.constant 0 : i32
    %c0_i32_0 = arith.constant 0 : i32
    %c0_i32_1 = arith.constant 0 : i32
    return %c0_i32, %c0_i32_0 : i32, i32
  }
  func.func @transform_2(%arg0: i32, %arg1: i32) -> (i32, i32) {
    %c0_i32 = arith.constant 0 : i32
    %c0_i32_0 = arith.constant 0 : i32
    %c0_i32_1 = arith.constant 0 : i32
    return %c0_i32, %c0_i32_0 : i32, i32
  }
  func.func @transform_3(%arg0: i32, %arg1: i32) -> (i32, i32, i32) {
    %c0_i32 = arith.constant 0 : i32
    %c0_i32_0 = arith.constant 0 : i32
    %c0_i32_1 = arith.constant 0 : i32
    %c0_i32_2 = arith.constant 0 : i32
    return %c0_i32, %c0_i32_0, %c0_i32_1 : i32, i32, i32
  }
  func.func @transform_4(%arg0: i32, %arg1: i32) -> (i32, i32, i32) {
    %c0_i32 = arith.constant 0 : i32
    %c0_i32_0 = arith.constant 0 : i32
    %c0_i32_1 = arith.constant 0 : i32
    %c0_i32_2 = arith.constant 0 : i32
    return %c0_i32, %c0_i32_0, %c0_i32_1 : i32, i32, i32
  }
  func.func @transform_5(%arg0: i32, %arg1: i32) -> (i32, i32, i32) {
    %c0_i32 = arith.constant 0 : i32
    %c0_i32_0 = arith.constant 0 : i32
    return %arg1, %arg0, %c0_i32 : i32, i32, i32
  }
  func.func @transform_6(%arg0: i32, %arg1: i32) -> (i32, i32, i32) {
    %c0_i32 = arith.constant 0 : i32
    %c0_i32_0 = arith.constant 0 : i32
    return %arg1, %arg0, %c0_i32 : i32, i32, i32
  }
  func.func @transform_7(%arg0: i32, %arg1: i32) -> (i32, i32, i32) {
    %c0_i32 = arith.constant 0 : i32
    %c0_i32_0 = arith.constant 0 : i32
    return %arg1, %arg0, %c0_i32 : i32, i32, i32
  }
}

module attributes {stable_mosaic.version = 11 : i64} {
  func.func @out_proj_kernel(%arg0: i32, %arg1: i32, %arg2: i32, %arg3: memref<1x8x8xf32, #tpu.memory_space<vmem>>, %arg4: memref<1x8x32xf32, #tpu.memory_space<vmem>>, %arg5: memref<1x32xf32, #tpu.memory_space<vmem>>, %arg6: memref<8x32xf32, #tpu.memory_space<vmem>>, %arg7: memref<8x32xf32, #tpu.memory_space<vmem>>, %arg8: memref<8x32xf32, #tpu.memory_space<vmem>>) attributes {dimension_semantics = [#tpu.dimension_semantics<parallel>, #tpu.dimension_semantics<parallel>, #tpu.dimension_semantics<arbitrary>], iteration_bounds = array<i64: 2, 1, 4>, scalar_prefetch = 0 : i64, scratch_operands = 1 : i64, tpu.core_type = #tpu.core_type<tc>, window_params = [{transform_indices = @transform_0, window_bounds = array<i64: 1, 8, 8>}, {transform_indices = @transform_1, window_bounds = array<i64: 1, 8, 32>}, {transform_indices = @transform_2, window_bounds = array<i64: 1, 32>}, {transform_indices = @transform_3, window_bounds = array<i64: 8, 32>}, {transform_indices = @transform_4, window_bounds = array<i64: 8, 32>}]} {
    %c0_i32 = arith.constant 0 : i32
    %0 = arith.cmpi eq, %arg2, %c0_i32 : i32
    %1 = arith.extui %0 : i1 to i32
    %c0_i32_0 = arith.constant 0 : i32
    %2 = arith.cmpi ne, %1, %c0_i32_0 : i32
    scf.if %2 {
      %cst_11 = arith.constant 0.000000e+00 : f32
      %14 = vector.broadcast %cst_11 : f32 to vector<8x32xf32>
      %c0_12 = arith.constant 0 : index
      %c0_13 = arith.constant 0 : index
      %15 = vector.load %arg8[%c0_12, %c0_13] : memref<8x32xf32, #tpu.memory_space<vmem>>, vector<8x32xf32>
      tpu.vector_store %arg8[%c0_12, %c0_13], %14 {strides = array<i32>} : memref<8x32xf32, #tpu.memory_space<vmem>>, vector<8x32xf32>,
    } else {
    }
    %c0 = arith.constant 0 : index
    %c0_1 = arith.constant 0 : index
    %3 = vector.load %arg8[%c0, %c0_1] : memref<8x32xf32, #tpu.memory_space<vmem>>, vector<8x32xf32>
    %c0_2 = arith.constant 0 : index
    %c0_3 = arith.constant 0 : index
    %c0_4 = arith.constant 0 : index
    %4 = vector.load %arg3[%c0_2, %c0_3, %c0_4] : memref<1x8x8xf32, #tpu.memory_space<vmem>>, vector<1x8x8xf32>
    %5 = vector.shape_cast %4 : vector<1x8x8xf32> to vector<8x8xf32>
    %c0_5 = arith.constant 0 : index
    %c0_6 = arith.constant 0 : index
    %c0_7 = arith.constant 0 : index
    %6 = vector.load %arg4[%c0_5, %c0_6, %c0_7] : memref<1x8x32xf32, #tpu.memory_space<vmem>>, vector<1x8x32xf32>
    %7 = vector.shape_cast %6 : vector<1x8x32xf32> to vector<8x32xf32>
    %cst = arith.constant dense<0.000000e+00> : vector<8x32xf32>
    %8 = tpu.matmul %5, %7, %cst {dimension_numbers = #tpu.dot_dimension_numbers<[1], [0], [0], [1], [0, 0, 1, 1], [], []>} : vector<8x8xf32>, vector<8x32xf32>, vector<8x32xf32> -> vector<8x32xf32>
    %9 = arith.addf %3, %8 : vector<8x32xf32>
    %c0_8 = arith.constant 0 : index
    %c0_9 = arith.constant 0 : index
    %10 = vector.load %arg8[%c0_8, %c0_9] : memref<8x32xf32, #tpu.memory_space<vmem>>, vector<8x32xf32>
    tpu.vector_store %arg8[%c0_8, %c0_9], %9 {strides = array<i32>} : memref<8x32xf32, #tpu.memory_space<vmem>>, vector<8x32xf32>,
    %c3_i32 = arith.constant 3 : i32
    %11 = arith.cmpi eq, %arg2, %c3_i32 : i32
    %12 = arith.extui %11 : i1 to i32
    %c0_i32_10 = arith.constant 0 : i32
    %13 = arith.cmpi ne, %12, %c0_i32_10 : i32
    scf.if %13 {
      %c0_11 = arith.constant 0 : index
      %c0_12 = arith.constant 0 : index
      %14 = vector.load %arg8[%c0_11, %c0_12] : memref<8x32xf32, #tpu.memory_space<vmem>>, vector<8x32xf32>
      %c0_13 = arith.constant 0 : index
      %c0_14 = arith.constant 0 : index
      %15 = vector.load %arg5[%c0_13, %c0_14] : memref<1x32xf32, #tpu.memory_space<vmem>>, vector<1x32xf32>
      %16 = vector.broadcast %15 : vector<1x32xf32> to vector<8x32xf32>
      %17 = arith.addf %14, %16 : vector<8x32xf32>
      %c0_15 = arith.constant 0 : index
      %c0_16 = arith.constant 0 : index
      %18 = vector.load %arg6[%c0_15, %c0_16] : memref<8x32xf32, #tpu.memory_space<vmem>>, vector<8x32xf32>
      %19 = arith.addf %17, %18 : vector<8x32xf32>
      %c0_17 = arith.constant 0 : index
      %c0_18 = arith.constant 0 : index
      %20 = vector.load %arg7[%c0_17, %c0_18] : memref<8x32xf32, #tpu.memory_space<vmem>>, vector<8x32xf32>
      tpu.vector_store %arg7[%c0_17, %c0_18], %19 {strides = array<i32>} : memref<8x32xf32, #tpu.memory_space<vmem>>, vector<8x32xf32>,
    } else {
    }
    return
  }
  func.func @transform_0(%arg0: i32, %arg1: i32, %arg2: i32) -> (i32, i32, i32) {
    %c0_i32 = arith.constant 0 : i32
    %c0_i32_0 = arith.constant 0 : i32
    return %arg2, %arg0, %c0_i32 : i32, i32, i32
  }
  func.func @transform_1(%arg0: i32, %arg1: i32, %arg2: i32) -> (i32, i32, i32) {
    %c0_i32 = arith.constant 0 : i32
    %c0_i32_0 = arith.constant 0 : i32
    return %arg2, %c0_i32, %arg1 : i32, i32, i32
  }
  func.func @transform_2(%arg0: i32, %arg1: i32, %arg2: i32) -> (i32, i32) {
    %c0_i32 = arith.constant 0 : i32
    %c0_i32_0 = arith.constant 0 : i32
    return %c0_i32, %arg1 : i32, i32
  }
  func.func @transform_3(%arg0: i32, %arg1: i32, %arg2: i32) -> (i32, i32) {
    %c0_i32 = arith.constant 0 : i32
    return %arg0, %arg1 : i32, i32
  }
  func.func @transform_4(%arg0: i32, %arg1: i32, %arg2: i32) -> (i32, i32) {
    %c0_i32 = arith.constant 0 : i32
    return %arg0, %arg1 : i32, i32
  }
}

module attributes {stable_mosaic.version = 11 : i64} {
  func.func @ln_ffn_kernel(%arg0: i32, %arg1: i32, %arg2: memref<8x32xf32, #tpu.memory_space<vmem>>, %arg3: memref<1x32xf32, #tpu.memory_space<vmem>>, %arg4: memref<1x32xf32, #tpu.memory_space<vmem>>, %arg5: memref<32x64xf32, #tpu.memory_space<vmem>>, %arg6: memref<1x64xf32, #tpu.memory_space<vmem>>, %arg7: memref<64x32xf32, #tpu.memory_space<vmem>>, %arg8: memref<1x32xf32, #tpu.memory_space<vmem>>, %arg9: memref<8x32xf32, #tpu.memory_space<vmem>>, %arg10: memref<8x32xf32, #tpu.memory_space<vmem>>, %arg11: memref<8x32xf32, #tpu.memory_space<vmem>>) attributes {dimension_semantics = [#tpu.dimension_semantics<parallel>, #tpu.dimension_semantics<arbitrary>], iteration_bounds = array<i64: 2, 1>, scalar_prefetch = 0 : i64, scratch_operands = 2 : i64, tpu.core_type = #tpu.core_type<tc>, window_params = [{transform_indices = @transform_0, window_bounds = array<i64: 8, 32>}, {pipeline_mode = #tpu.pipeline_mode<synchronous>, transform_indices = @transform_1, window_bounds = array<i64: 1, 32>}, {pipeline_mode = #tpu.pipeline_mode<synchronous>, transform_indices = @transform_2, window_bounds = array<i64: 1, 32>}, {transform_indices = @transform_3, window_bounds = array<i64: 32, 64>}, {transform_indices = @transform_4, window_bounds = array<i64: 1, 64>}, {transform_indices = @transform_5, window_bounds = array<i64: 64, 32>}, {pipeline_mode = #tpu.pipeline_mode<synchronous>, transform_indices = @transform_6, window_bounds = array<i64: 1, 32>}, {transform_indices = @transform_7, window_bounds = array<i64: 8, 32>}]} {
    %c0_i32 = arith.constant 0 : i32
    %0 = arith.cmpi eq, %arg1, %c0_i32 : i32
    %1 = arith.extui %0 : i1 to i32
    %c0_i32_0 = arith.constant 0 : i32
    %2 = arith.cmpi ne, %1, %c0_i32_0 : i32
    scf.if %2 {
      %c0_16 = arith.constant 0 : index
      %c0_17 = arith.constant 0 : index
      %19 = vector.load %arg2[%c0_16, %c0_17] : memref<8x32xf32, #tpu.memory_space<vmem>>, vector<8x32xf32>
      %c0_18 = arith.constant 0 : index
      %c0_19 = arith.constant 0 : index
      %20 = vector.load %arg3[%c0_18, %c0_19] : memref<1x32xf32, #tpu.memory_space<vmem>>, vector<1x32xf32>
      %c0_20 = arith.constant 0 : index
      %c0_21 = arith.constant 0 : index
      %21 = vector.load %arg4[%c0_20, %c0_21] : memref<1x32xf32, #tpu.memory_space<vmem>>, vector<1x32xf32>
      %cst_22 = arith.constant dense<0.000000e+00> : vector<8xf32>
      %22 = vector.multi_reduction <add>, %19, %cst_22 [1] : vector<8x32xf32> to vector<8xf32>
      %23 = vector.shape_cast %22 : vector<8xf32> to vector<8x1xf32>
      %cst_23 = arith.constant 3.200000e+01 : f32
      %24 = vector.broadcast %cst_23 : f32 to vector<8x1xf32>
      %25 = arith.divf %23, %24 : vector<8x1xf32>
      %26 = vector.broadcast %25 : vector<8x1xf32> to vector<8x32xf32>
      %27 = arith.subf %19, %26 : vector<8x32xf32>
      %28 = arith.mulf %27, %27 : vector<8x32xf32>
      %cst_24 = arith.constant dense<0.000000e+00> : vector<8xf32>
      %29 = vector.multi_reduction <add>, %28, %cst_24 [1] : vector<8x32xf32> to vector<8xf32>
      %30 = vector.shape_cast %29 : vector<8xf32> to vector<8x1xf32>
      %cst_25 = arith.constant 0.0322580636 : f32
      %31 = vector.broadcast %cst_25 : f32 to vector<8x1xf32>
      %32 = arith.mulf %30, %31 : vector<8x1xf32>
      %33 = math.sqrt %32 : vector<8x1xf32>
      %34 = vector.broadcast %20 : vector<1x32xf32> to vector<8x32xf32>
      %35 = arith.mulf %34, %27 : vector<8x32xf32>
      %cst_26 = arith.constant 9.99999997E-7 : f32
      %36 = vector.broadcast %cst_26 : f32 to vector<8x1xf32>
      %37 = arith.addf %33, %36 : vector<8x1xf32>
      %38 = vector.broadcast %37 : vector<8x1xf32> to vector<8x32xf32>
      %39 = arith.divf %35, %38 : vector<8x32xf32>
      %40 = vector.broadcast %21 : vector<1x32xf32> to vector<8x32xf32>
      %41 = arith.addf %39, %40 : vector<8x32xf32>
      %c0_27 = arith.constant 0 : index
      %c0_28 = arith.constant 0 : index
      %42 = vector.load %arg10[%c0_27, %c0_28] : memref<8x32xf32, #tpu.memory_space<vmem>>, vector<8x32xf32>
      tpu.vector_store %arg10[%c0_27, %c0_28], %41 {strides = array<i32>} : memref<8x32xf32, #tpu.memory_space<vmem>>, vector<8x32xf32>,
      %cst_29 = arith.constant 0.000000e+00 : f32
      %43 = vector.broadcast %cst_29 : f32 to vector<8x32xf32>
      %c0_30 = arith.constant 0 : index
      %c0_31 = arith.constant 0 : index
      %44 = vector.load %arg11[%c0_30, %c0_31] : memref<8x32xf32, #tpu.memory_space<vmem>>, vector<8x32xf32>
      tpu.vector_store %arg11[%c0_30, %c0_31], %43 {strides = array<i32>} : memref<8x32xf32, #tpu.memory_space<vmem>>, vector<8x32xf32>,
    } else {
    }
    %c0 = arith.constant 0 : index
    %c0_1 = arith.constant 0 : index
    %3 = vector.load %arg10[%c0, %c0_1] : memref<8x32xf32, #tpu.memory_space<vmem>>, vector<8x32xf32>
    %c0_2 = arith.constant 0 : index
    %c0_3 = arith.constant 0 : index
    %4 = vector.load %arg5[%c0_2, %c0_3] : memref<32x64xf32, #tpu.memory_space<vmem>>, vector<32x64xf32>
    %cst = arith.constant dense<0.000000e+00> : vector<8x64xf32>
    %5 = tpu.matmul %3, %4, %cst {dimension_numbers = #tpu.dot_dimension_numbers<[1], [0], [0], [1], [0, 0, 1, 1], [], []>} : vector<8x32xf32>, vector<32x64xf32>, vector<8x64xf32> -> vector<8x64xf32>
    %c0_4 = arith.constant 0 : index
    %c0_5 = arith.constant 0 : index
    %6 = vector.load %arg6[%c0_4, %c0_5] : memref<1x64xf32, #tpu.memory_space<vmem>>, vector<1x64xf32>
    %7 = vector.broadcast %6 : vector<1x64xf32> to vector<8x64xf32>
    %8 = arith.addf %5, %7 : vector<8x64xf32>
    %cst_6 = arith.constant 0.000000e+00 : f32
    %9 = vector.broadcast %cst_6 : f32 to vector<8x64xf32>
    %10 = arith.maximumf %8, %9 : vector<8x64xf32>
    %c0_7 = arith.constant 0 : index
    %c0_8 = arith.constant 0 : index
    %11 = vector.load %arg11[%c0_7, %c0_8] : memref<8x32xf32, #tpu.memory_space<vmem>>, vector<8x32xf32>
    %c0_9 = arith.constant 0 : index
    %c0_10 = arith.constant 0 : index
    %12 = vector.load %arg7[%c0_9, %c0_10] : memref<64x32xf32, #tpu.memory_space<vmem>>, vector<64x32xf32>
    %cst_11 = arith.constant dense<0.000000e+00> : vector<8x32xf32>
    %13 = tpu.matmul %10, %12, %cst_11 {dimension_numbers = #tpu.dot_dimension_numbers<[1], [0], [0], [1], [0, 0, 1, 1], [], []>} : vector<8x64xf32>, vector<64x32xf32>, vector<8x32xf32> -> vector<8x32xf32>
    %14 = arith.addf %11, %13 : vector<8x32xf32>
    %c0_12 = arith.constant 0 : index
    %c0_13 = arith.constant 0 : index
    %15 = vector.load %arg11[%c0_12, %c0_13] : memref<8x32xf32, #tpu.memory_space<vmem>>, vector<8x32xf32>
    tpu.vector_store %arg11[%c0_12, %c0_13], %14 {strides = array<i32>} : memref<8x32xf32, #tpu.memory_space<vmem>>, vector<8x32xf32>,
    %c0_i32_14 = arith.constant 0 : i32
    %16 = arith.cmpi eq, %arg1, %c0_i32_14 : i32
    %17 = arith.extui %16 : i1 to i32
    %c0_i32_15 = arith.constant 0 : i32
    %18 = arith.cmpi ne, %17, %c0_i32_15 : i32
    scf.if %18 {
      %c0_16 = arith.constant 0 : index
      %c0_17 = arith.constant 0 : index
      %19 = vector.load %arg2[%c0_16, %c0_17] : memref<8x32xf32, #tpu.memory_space<vmem>>, vector<8x32xf32>
      %c0_18 = arith.constant 0 : index
      %c0_19 = arith.constant 0 : index
      %20 = vector.load %arg11[%c0_18, %c0_19] : memref<8x32xf32, #tpu.memory_space<vmem>>, vector<8x32xf32>
      %21 = arith.addf %19, %20 : vector<8x32xf32>
      %c0_20 = arith.constant 0 : index
      %c0_21 = arith.constant 0 : index
      %22 = vector.load %arg8[%c0_20, %c0_21] : memref<1x32xf32, #tpu.memory_space<vmem>>, vector<1x32xf32>
      %23 = vector.broadcast %22 : vector<1x32xf32> to vector<8x32xf32>
      %24 = arith.addf %21, %23 : vector<8x32xf32>
      %c0_22 = arith.constant 0 : index
      %c0_23 = arith.constant 0 : index
      %25 = vector.load %arg9[%c0_22, %c0_23] : memref<8x32xf32, #tpu.memory_space<vmem>>, vector<8x32xf32>
      tpu.vector_store %arg9[%c0_22, %c0_23], %24 {strides = array<i32>} : memref<8x32xf32, #tpu.memory_space<vmem>>, vector<8x32xf32>,
    } else {
    }
    return
  }
  func.func @transform_0(%arg0: i32, %arg1: i32) -> (i32, i32) {
    %c0_i32 = arith.constant 0 : i32
    %c0_i32_0 = arith.constant 0 : i32
    return %arg0, %c0_i32 : i32, i32
  }
  func.func @transform_1(%arg0: i32, %arg1: i32) -> (i32, i32) {
    %c0_i32 = arith.constant 0 : i32
    %c0_i32_0 = arith.constant 0 : i32
    %c0_i32_1 = arith.constant 0 : i32
    return %c0_i32, %c0_i32_0 : i32, i32
  }
  func.func @transform_2(%arg0: i32, %arg1: i32) -> (i32, i32) {
    %c0_i32 = arith.constant 0 : i32
    %c0_i32_0 = arith.constant 0 : i32
    %c0_i32_1 = arith.constant 0 : i32
    return %c0_i32, %c0_i32_0 : i32, i32
  }
  func.func @transform_3(%arg0: i32, %arg1: i32) -> (i32, i32) {
    %c0_i32 = arith.constant 0 : i32
    %c0_i32_0 = arith.constant 0 : i32
    return %c0_i32, %arg1 : i32, i32
  }
  func.func @transform_4(%arg0: i32, %arg1: i32) -> (i32, i32) {
    %c0_i32 = arith.constant 0 : i32
    %c0_i32_0 = arith.constant 0 : i32
    return %c0_i32, %arg1 : i32, i32
  }
  func.func @transform_5(%arg0: i32, %arg1: i32) -> (i32, i32) {
    %c0_i32 = arith.constant 0 : i32
    %c0_i32_0 = arith.constant 0 : i32
    return %arg1, %c0_i32 : i32, i32
  }
  func.func @transform_6(%arg0: i32, %arg1: i32) -> (i32, i32) {
    %c0_i32 = arith.constant 0 : i32
    %c0_i32_0 = arith.constant 0 : i32
    %c0_i32_1 = arith.constant 0 : i32
    return %c0_i32, %c0_i32_0 : i32, i32
  }
  func.func @transform_7(%arg0: i32, %arg1: i32) -> (i32, i32) {
    %c0_i32 = arith.constant 0 : i32
    %c0_i32_0 = arith.constant 0 : i32
    return %arg0, %c0_i32 : i32, i32
  }
}

module attributes {stable_mosaic.version = 11 : i64} {
  func.func @layernorm_kernel(%arg0: i32, %arg1: memref<8x32xf32, #tpu.memory_space<vmem>>, %arg2: memref<1x32xf32, #tpu.memory_space<vmem>>, %arg3: memref<1x32xf32, #tpu.memory_space<vmem>>, %arg4: memref<8x32xf32, #tpu.memory_space<vmem>>) attributes {dimension_semantics = [#tpu.dimension_semantics<parallel>], iteration_bounds = array<i64: 2>, scalar_prefetch = 0 : i64, scratch_operands = 0 : i64, tpu.core_type = #tpu.core_type<tc>, window_params = [{transform_indices = @transform_0, window_bounds = array<i64: 8, 32>}, {pipeline_mode = #tpu.pipeline_mode<synchronous>, transform_indices = @transform_1, window_bounds = array<i64: 1, 32>}, {pipeline_mode = #tpu.pipeline_mode<synchronous>, transform_indices = @transform_2, window_bounds = array<i64: 1, 32>}, {transform_indices = @transform_3, window_bounds = array<i64: 8, 32>}]} {
    %c0 = arith.constant 0 : index
    %c0_0 = arith.constant 0 : index
    %0 = vector.load %arg1[%c0, %c0_0] : memref<8x32xf32, #tpu.memory_space<vmem>>, vector<8x32xf32>
    %c0_1 = arith.constant 0 : index
    %c0_2 = arith.constant 0 : index
    %1 = vector.load %arg2[%c0_1, %c0_2] : memref<1x32xf32, #tpu.memory_space<vmem>>, vector<1x32xf32>
    %c0_3 = arith.constant 0 : index
    %c0_4 = arith.constant 0 : index
    %2 = vector.load %arg3[%c0_3, %c0_4] : memref<1x32xf32, #tpu.memory_space<vmem>>, vector<1x32xf32>
    %cst = arith.constant dense<0.000000e+00> : vector<8xf32>
    %3 = vector.multi_reduction <add>, %0, %cst [1] : vector<8x32xf32> to vector<8xf32>
    %4 = vector.shape_cast %3 : vector<8xf32> to vector<8x1xf32>
    %cst_5 = arith.constant 3.200000e+01 : f32
    %5 = vector.broadcast %cst_5 : f32 to vector<8x1xf32>
    %6 = arith.divf %4, %5 : vector<8x1xf32>
    %7 = vector.broadcast %6 : vector<8x1xf32> to vector<8x32xf32>
    %8 = arith.subf %0, %7 : vector<8x32xf32>
    %9 = arith.mulf %8, %8 : vector<8x32xf32>
    %cst_6 = arith.constant dense<0.000000e+00> : vector<8xf32>
    %10 = vector.multi_reduction <add>, %9, %cst_6 [1] : vector<8x32xf32> to vector<8xf32>
    %11 = vector.shape_cast %10 : vector<8xf32> to vector<8x1xf32>
    %cst_7 = arith.constant 0.0322580636 : f32
    %12 = vector.broadcast %cst_7 : f32 to vector<8x1xf32>
    %13 = arith.mulf %11, %12 : vector<8x1xf32>
    %14 = math.sqrt %13 : vector<8x1xf32>
    %15 = vector.broadcast %1 : vector<1x32xf32> to vector<8x32xf32>
    %16 = arith.mulf %15, %8 : vector<8x32xf32>
    %cst_8 = arith.constant 9.99999997E-7 : f32
    %17 = vector.broadcast %cst_8 : f32 to vector<8x1xf32>
    %18 = arith.addf %14, %17 : vector<8x1xf32>
    %19 = vector.broadcast %18 : vector<8x1xf32> to vector<8x32xf32>
    %20 = arith.divf %16, %19 : vector<8x32xf32>
    %21 = vector.broadcast %2 : vector<1x32xf32> to vector<8x32xf32>
    %22 = arith.addf %20, %21 : vector<8x32xf32>
    %c0_9 = arith.constant 0 : index
    %c0_10 = arith.constant 0 : index
    %23 = vector.load %arg4[%c0_9, %c0_10] : memref<8x32xf32, #tpu.memory_space<vmem>>, vector<8x32xf32>
    tpu.vector_store %arg4[%c0_9, %c0_10], %22 {strides = array<i32>} : memref<8x32xf32, #tpu.memory_space<vmem>>, vector<8x32xf32>,
    return
  }
  func.func @transform_0(%arg0: i32) -> (i32, i32) {
    %c0_i32 = arith.constant 0 : i32
    %c0_i32_0 = arith.constant 0 : i32
    return %arg0, %c0_i32 : i32, i32
  }
  func.func @transform_1(%arg0: i32) -> (i32, i32) {
    %c0_i32 = arith.constant 0 : i32
    %c0_i32_0 = arith.constant 0 : i32
    %c0_i32_1 = arith.constant 0 : i32
    return %c0_i32, %c0_i32_0 : i32, i32
  }
  func.func @transform_2(%arg0: i32) -> (i32, i32) {
    %c0_i32 = arith.constant 0 : i32
    %c0_i32_0 = arith.constant 0 : i32
    %c0_i32_1 = arith.constant 0 : i32
    return %c0_i32, %c0_i32_0 : i32, i32
  }
  func.func @transform_3(%arg0: i32) -> (i32, i32) {
    %c0_i32 = arith.constant 0 : i32
    %c0_i32_0 = arith.constant 0 : i32
    return %arg0, %c0_i32 : i32, i32
  }
}

</mosaic_0001>

<bundles_post_ra>
// kernel: tpu_custom_call.1
= control target key start
LH: loop header
LB: loop body
LE: loop exit
PB: predicated region body
PF: predicated region fallthrough
CT: control target
= control target key end

     0   :  { %6 = vsyncpa [#allocation3], 0  ;;  %s441_s0 = inlined_call_operand.hbm [shape: f32[8,128], index: 0, kind: input, shape index: {}]   ;;  %s442_s1 = inlined_call_operand.hbm [shape: f32[16,128], index: 1, kind: output, shape index: {}]  }
   0x1   :  { %7 = vsyncpa [#allocation4], 0 }
   0x2   :  { %9 = vsyncpa [#allocation4 + $0x1], 0  ;;  %s357_s6 = smov 0   ;;  %s359_s7 = smov 0  }
   0x3   :  { %s361_s8 = smov 0   ;;  %s363_s9 = smov 0  }
   0x4 LB: > { %s378_s10 = sadd.s32 4294967295, %s344_s9   ;;  %s188_s11 = sadd.s32 4294967294, %s344_s9   ;;  %s344_s9 = sphi %s363_s9, %s448_s9   ;;  %s340_s8 = sphi %s361_s8, %s447_s8   ;;  %s336_s7 = sphi %s359_s7, %s446_s7   ;;  %s332_s6 = sphi %s357_s6, %s445_s6  }
   0x5   : > { %s382_s12 = sadd.s32 1, %s344_s9   ;;  %s43_s13 = sadd.s32 1, %s340_s8 }
   0x6   : > { %s40_s14 = ssub.s32 %s344_s9, %s382_s12  ;;  %p53_p0 = scmp.ne.s32.totalorder %s340_s8, %s336_s7 }
   0x7   : > { %p41_p1 = scmp.eq.s32.totalorder %s40_s14, 0  ;;  %p54_p2 = scmp.eq.s32.totalorder %s378_s10, 1 }
   0x8   : > { %p59_p3 = scmp.ne.s32.totalorder %s336_s7, %s332_s6  ;;  %p60_p4 = scmp.eq.s32.totalorder %s188_s11, 1 }
   0x9   : > { %s393_s15 = scalar_select %p41_p1, %s340_s8, %s43_s13  }
   0xa   : > { %p395_p5 = por %p54_p2, %p53_p0  ;;  %p399_p6 = por %p60_p4, %p59_p3 }
   0xb   : > { %p189_p7 = scmp.ge.s32.totalorder %s344_s9, 1  ;;  %p67_p8 = scmp.lt.s32.totalorder %s344_s9, 3 }
   0xc   : > { %p212_p9 = scmp.eq.s32.totalorder %s378_s10, 0  ;;  %s79_s20 = sshll.u32 %s441_s0, 4  ;;  %s80_s20 = int_to_ptr.hbm [resolvable:$true] %s79_s20 }
   0xd   : > { %p68_p10 = pnand %p189_p7, %p67_p8  ;;  %s346_s21 = smov [#allocation2]  }
   0xe   : > { %s81_s22 = sshll.u32 %s346_s21, 4  ;;  %s82_s22 = int_to_ptr.vmem [resolvable:$true] %s81_s22 }
   0xf   : > { %p204_p11 = pneg %p68_p10  ;;  %94 = sbr.rel (%p68_p10) target bundleno = 37 (0x25), region = 24 }
  0x11   : > { %p205_p12 = pnand %p212_p9, %p204_p11 }
  0x13   : > { %207 = dma.hbm_to_vmem [thread:$0]  (!%p205_p12), %s80_s20, 128, %s82_s22, [#allocation3]  }
  0x14   : > { %323 = dma.done.wait (%p212_p9), [#allocation3], 128  }
  0x15   : > { %325 = vsyncadd (%p212_p9), [#allocation3], 4294967168  ;;  %s107_s23 = sand.u32 1, %s336_s7   ;;  %s195_s24 = sshll.u32 %s378_s10, 3  ;;  %v110_v0 = vld [vmem:[#allocation2] sm:$0xff] }
  0x16   : > { %s193_s25 = sshll.u32 %s107_s23, 3  ;;  %s124_s28 = scalar_lea.hbm %s442_s1, %s195_s24  ;;  %v111_v1 = vmul.f32 2.0, %v110_v0 }
  0x17   : > { %s109_s29 = scalar_lea.vmem [#allocation5], %s193_s25  ;;  %s128_s2 = sshll.u32 %s124_s28, 4  ;;  %s129_s2 = int_to_ptr.hbm [resolvable:$true] %s128_s2 }
  0x18   : > { %s126_s30 = sshll.u32 %s109_s29, 4  ;;  %112 = vst [vmem:[%s109_s29] sm:$0xff] %v111_v1  ;;  %s114_s3 = scalar_lea.sflag [#allocation4], %s107_s23  ;;  %s127_s30 = int_to_ptr.vmem [resolvable:$true] %s126_s30 }
  0x19   : > { %s292_s4 = sshra.s32 %s129_s2, 4  ;;  %s298_s13 = scalar_lea.hbm %s442_s1, 16  ;;  %s293_s4 = int_to_ptr.hbm [resolvable:$true] %s292_s4 }
  0x1a   : > { %s294_s5 = scalar_lea.hbm %s293_s4, 8  ;;  %p299_p2 = scmp.lt.s32.totalorder %s293_s4, %s442_s1 }
  0x1b   : > { %p295_p13 = scmp.ne.s32.totalorder %s293_s4, %s294_s5  ;;  %p300_p3 = scmp.lt.s32.totalorder %s298_s13, %s294_s5 }
  0x1d   : > { %p296_p0 = pnand %p295_p13, %p395_p5  ;;  %p301_p4 = por %p300_p3, %p299_p2 }
  0x1f   : > { %p297_p1 = pneg %p296_p0 }
  0x21   : > { %p302_p7 = pnand %p301_p4, %p297_p1 }
  0x23   : > { %305 = shalt.err (!%p302_p7)
}
  0x24   : > { %202 = dma.vmem_to_hbm [thread:$0]  (%p395_p5), %s127_s30, 128, %s129_s2, %s114_s3  }
  0x25 PF: > { %p214_p8 = scmp.ge.s32.totalorder %s344_s9, 2  ;;  %s140_s19 = sand.u32 1, %s332_s6  }
  0x26   : > { %s141_s20 = scalar_lea.sflag [#allocation4], %s140_s19 }
  0x27   : > { %p209_p9 = pnand %p214_p8, %p399_p6 }
  0x29   : > { %p210_p10 = pneg %p209_p9 }
  0x2b   : > { %327 = dma.done.wait (%p210_p10), %s141_s20, 128  }
  0x2c   : > { %329 = vsyncadd (%p210_p10), %s141_s20, 4294967168  ;;  %p12_p11 = scmp.ge.s32.totalorder %s382_s12, 4   ;;  %s445_s6 = smov %s336_s7 }
  0x2d   : > { %s446_s7 = smov %s340_s8  ;;  %s447_s8 = smov %s393_s15 }
  0x2e   : > { %s448_s9 = smov %s382_s12  ;;  %14 = sbr.rel (!%p12_p11) target bundleno = 4 (0x4), region = 61 }
  0x33   :  { %147 = vsyncpa [#allocation3], 1 }
  0x34   :  { %149 = vsyncpa [#allocation3 + $0x1], 1 }
  0x35   :  { %150 = vsyncpa [#allocation4], 1 }
  0x36   :  { %152 = vsyncpa [#allocation4 + $0x1], 1 }

// kernel: encoder_forward.10
= control target key start
LH: loop header
LB: loop body
LE: loop exit
PB: predicated region body
PF: predicated region fallthrough
CT: control target
= control target key end

     0   :  { %s646_s15 = smov 0   ;;  %s648_s16 = smov 0   ;;  %s718_s0 = inlined_call_operand.vmem [shape: f32[4,16,8], index: 0, kind: input, shape index: {}]   ;;  %s719_s1 = inlined_call_operand.vmem [shape: f32[4,16,8], index: 1, kind: input, shape index: {}]   ;;  %s720_s2 = inlined_call_operand.vmem [shape: f32[4,16,8], index: 2, kind: input, shape index: {}]   ;;  %s721_s3 = inlined_call_operand.vmem [shape: f32[2,1,8], index: 3, kind: input, shape index: {}]   ;;  %s722_s4 = inlined_call_operand.vmem [shape: f32[4,16,8], index: 4, kind: output, shape index: {}]  }
   0x1   :  { %s650_s17 = smov 0   ;;  %s652_s18 = smov 0  }
   0x2   :  { %s654_s19 = smov 0  }
   0x3 LB: > { %s23_s20 = sadd.s32 1, %s611_s17  ;;  %s26_s21 = sadd.s32 1, %s615_s18  ;;  %s619_s19 = sphi %s654_s19, %s14_s19   ;;  %s615_s18 = sphi %s652_s18, %s726_s18   ;;  %s611_s17 = sphi %s650_s17, %s725_s17   ;;  %s607_s16 = sphi %s648_s16, %s724_s16   ;;  %s603_s15 = sphi %s646_s15, %s723_s15  }
   0x4   : > { %p24_p0 = scmp.ge.s32.totalorder %s23_s20, 4  ;;  %p522_p1 = scmp.ge.s32.totalorder %s619_s19, 1 }
   0x5   : > { %p219_p2 = scmp.lt.s32.totalorder %s619_s19, 9 }
   0x6   : > { %s728_s20 = smov (%p24_p0, %s23_s20), 0  ;;  %s730_s21 = smov (!%p24_p0, %s26_s21), %s615_s18 }
   0x7   : > { %p220_p3 = pnand %p522_p1, %p219_p2  ;;  %p28_p4 = scmp.ge.s32.totalorder %s730_s21, 2 }
   0x8   : > { %p270_p5 = scmp.lt.s32.totalorder (!%p220_p3), %s603_s15, 3  ;;  %p272_p6 = scmp.lt.s32.totalorder (!%p220_p3), %s607_s16, 1 }
   0x9   : > { %s732_s21 = smov (%p28_p4, %s730_s21), 0  ;;  %223 = sbr.rel (%p220_p3) target bundleno = 542 (0x21e), region = 36 }
   0xe   : > { %s734_s15 = smov (!%p270_p5, %s603_s15), 3  ;;  %s736_s16 = smov (!%p272_p6, %s607_s16), 1  ;;  %vm312_vm0 = vcmask 64512  }
   0xf   : > { %s523_s22 = sshll.u32 %s734_s15, 1  ;;  %s296_s26 = scalar_lea.vmem %s721_s3, %s736_s16 }
  0x10   : > { %s275_s23 = sadd.s32 %s523_s22, %s736_s16  ;;  %v576_v2 = vld [vmem:[%s296_s26] ss:$0 sm:$0xff] }
  0x11   : > { %s679_s27 = sshll.u32 %s275_s23, 3 }
  0x12   : > { %s285_s30 = scalar_lea.vmem %s719_s1, %s679_s27  ;;  %s277_s7 = scalar_lea.vmem %s718_s0, %s679_s27 }
  0x13   : > { %v306_v0 = vld [vmem:[%s285_s30] sm:$0xff]  ;;  %s293_s10 = scalar_lea.vmem %s720_s2, %s679_s27  ;;  %s304_s13 = scalar_lea.vmem %s722_s4, %s679_s27 }
  0x14   : > { %531 = vmatpush.xpose.msk.msra.mxu0 %vm312_vm0, %v306_v0  ;;  %v305_v1 = vld [vmem:[%s277_s7] sm:$0xff] }
  0x15   : > { %v307_v11 = vld [vmem:[%s293_s10] sm:$0xff] }
  0x16   : > { %381 = vmatpush.msra.mxu1 %v307_v11 }
  0x17   : > { %532 = vmatmul.msk.f32.vlgmr.msra.gmra.mxu0 %vm312_vm0, %v305_v1 }
  0x94   : > { %v336_v3 = vpop.f32.mrf.mxu0 }
  0x95   : > { %v337_v4 = vadd.f32 %v576_v2, %v336_v3 }
  0x97   : > { %v339_v5 = vsel %vm312_vm0, %v337_v4, -inf }
  0x98   : > { %340 = vmax.xlane.f32.xlu0 %v339_v5 }
 0x10b   : > { %v341_v6 = vpop.xlane.xlu0 %340 }
 0x10c   : > { %v342_v7 = vsub.f32 %v337_v4, %v341_v6 }
 0x10e   : > { %v343_v8 = vmul.f32 1.442695, %v342_v7 }
 0x110   : > { %577 = vpow2.f32 %v343_v8 }
 0x116   : > { %v578_v9 = vpop.eup %577 }
 0x117   : > { %v345_v10 = vsel %vm312_vm0, %v578_v9, 0.0 }
 0x118   : > { %346 = vadd.xlane.f32.xlu0 %v345_v10 }
 0x18b   : > { %v347_v12 = vpop.xlane.xlu0 %346 }
 0x18c   : > { %579 = vrcp.f32 %v347_v12  ;;  %v359_v16 = vand.u32 2147483648, %v347_v12  ;;  %v357_v18 = vand.u32 2147483647, %v347_v12  ;;  %vm353_vm2 = vweird.f32 %v347_v12 }
 0x18e   : > { %v360_v20 = vor.u32 1.1754944e-38, %v359_v16  ;;  %vm358_vm4 = vcmp.eq.f32.partialorder %v357_v18, 8.507059e+37 }
 0x192   : > { %v580_v13 = vpop.eup %579 }
 0x193   : > { %v349_v14 = vmul.f32 %v580_v13, %v347_v12  ;;  %vm354_vm1 = vweird.f32 %v580_v13 }
 0x194   : > { %vm355_vm3 = vmor %vm353_vm2, %vm354_vm1 }
 0x195   : > { %v350_v15 = vsub.f32 1.0, %v349_v14 }
 0x197   : > { %v351_v17 = vmul.f32 %v580_v13, %v350_v15 }
 0x199   : > { %v352_v19 = vadd.f32 %v580_v13, %v351_v17 }
 0x19b   : > { %v356_v21 = vsel %vm355_vm3, %v580_v13, %v352_v19 }
 0x19c   : > { %v361_v22 = vsel %vm358_vm4, %v360_v20, %v356_v21 }
 0x19d   : > { %v362_v23 = vmul.f32 %v578_v9, %v361_v22 }
 0x19f   : > { %533 = vmatmul.msk.f32.vlgmr.msra.gmra.mxu1 %vm312_vm0, %v362_v23 }
 0x21c   : > { %v383_v24 = vpop.f32.mrf.mxu1 }
 0x21d   : > { %386 = vst.msk [vmem:[%s304_s13] sm:$0xff] %vm312_vm0, %v383_v24 }
 0x21e PF: > { %s14_s19 = sadd.s32 1, %s619_s19   ;;  %s723_s15 = smov %s611_s17 }
 0x21f   : > { %p11_p7 = scmp.ge.s32.totalorder %s14_s19, 10   ;;  %s724_s16 = smov %s615_s18 }
 0x220   : > { %s725_s17 = smov %s728_s20  ;;  %s726_s18 = smov %s732_s21 }
 0x221   :  { %13 = sbr.rel (!%p11_p7) target bundleno = 3 (0x3), region = 75 }

// kernel: encoder_forward.9
= control target key start
LH: loop header
LB: loop body
LE: loop exit
PB: predicated region body
PF: predicated region fallthrough
CT: control target
= control target key end

     0   :  { %s775_s24 = smov 0   ;;  %s777_s25 = smov 0   ;;  %s874_s0 = inlined_call_operand.vmem [shape: f32[16,32], index: 0, kind: input, shape index: {}]   ;;  %s875_s1 = inlined_call_operand.vmem [shape: f32[1,32], index: 1, kind: input, shape index: {}]   ;;  %s876_s2 = inlined_call_operand.vmem [shape: f32[1,32], index: 2, kind: input, shape index: {}]   ;;  %s877_s3 = inlined_call_operand.vmem [shape: f32[4,32,24], index: 3, kind: input, shape index: {}]   ;;  %s878_s4 = inlined_call_operand.vmem [shape: f32[4,1,24], index: 4, kind: input, shape index: {}]   ;;  %s879_s5 = inlined_call_operand.vmem [shape: f32[4,16,8], index: 5, kind: output, shape index: {0}]   ;;  %s880_s6 = inlined_call_operand.vmem [shape: f32[4,16,8], index: 6, kind: output, shape index: {1}]   ;;  %s881_s7 = inlined_call_operand.vmem [shape: f32[4,16,8], index: 7, kind: output, shape index: {2}]  }
   0x1   :  { %s779_s26 = smov 0   ;;  %s781_s27 = smov 0  }
   0x2   :  { %s783_s28 = smov 0  }
   0x3 LB: > { %s27_s29 = sadd.s32 1, %s722_s26  ;;  %s30_s30 = sadd.s32 1, %s726_s27  ;;  %s730_s28 = sphi %s783_s28, %s18_s28   ;;  %s726_s27 = sphi %s781_s27, %s885_s27   ;;  %s722_s26 = sphi %s779_s26, %s884_s26   ;;  %s718_s25 = sphi %s777_s25, %s883_s25   ;;  %s714_s24 = sphi %s775_s24, %s882_s24  }
   0x4   : > { %p28_p0 = scmp.ge.s32.totalorder %s27_s29, 4  ;;  %p627_p1 = scmp.ge.s32.totalorder %s730_s28, 1 }
   0x5   : > { %p259_p2 = scmp.lt.s32.totalorder %s730_s28, 9 }
   0x6   : > { %s887_s29 = smov (%p28_p0, %s27_s29), 0  ;;  %s889_s30 = smov (!%p28_p0, %s30_s30), %s726_s27 }
   0x7   : > { %p260_p3 = pnand %p627_p1, %p259_p2  ;;  %p32_p4 = scmp.ge.s32.totalorder %s889_s30, 2 }
   0x8   : > { %p309_p5 = scmp.lt.s32.totalorder (!%p260_p3), %s718_s25, 1  ;;  %p313_p6 = scmp.lt.s32.totalorder (!%p260_p3), %s714_s24, 3 }
   0x9   : > { %s891_s30 = smov (%p32_p4, %s889_s30), 0  ;;  %263 = sbr.rel (%p260_p3) target bundleno = 573 (0x23d), region = 40 }
   0xa   : > { %p635_p7 = scmp.ne.s32.totalorder (!%p260_p3), %s714_s24, 0 }
   0xe   : > { %s893_s25 = smov (!%p309_p5, %s718_s25), 1 }
   0xf   : > { %s314_s8 = scalar_select %p313_p6, %s714_s24, 3 }
  0x10   : > { %s628_s9 = sshll.u32 %s893_s25, 3 }
  0x11   : > { %s312_s12 = scalar_lea.vmem %s874_s0, %s628_s9  ;;  %s629_s13 = sshll.u32 %s314_s8, 1 }
  0x12   : > { %s318_s14 = sadd.s32 %s629_s13, %s893_s25  ;;  %340 = sbr.rel (%p635_p7) target bundleno = 311 (0x137), region = 44 }
  0x13   : > { %s812_s15 = sshll.u32 %s318_s14, 3 }
  0x14   : > { %s320_s18 = scalar_lea.vmem %s879_s5, %s812_s15  ;;  %s328_s21 = scalar_lea.vmem %s880_s6, %s812_s15 }
  0x15   : > { %s336_s10 = scalar_lea.vmem %s881_s7, %s812_s15 }
  0x17   : > { %v341_v0 = vld [vmem:[%s312_s12] sm:$0xff]  ;;  %vm344_vm0 = vcmask 261120   ;;  %v732_v2 = vmov 32.0  }
  0x18   : > { %v345_v1 = vsel %vm344_vm0, %v341_v0, 0.0  ;;  %685 = vrcp.f32 %v732_v2  ;;  %v683_v31 = vld [vmem:[%s875_s1] ss:$0 sm:$0xff] }
  0x19   : > { %346 = vadd.xlane.f32.xlu0 %v345_v1  ;;  %v684_v37 = vld [vmem:[%s876_s2] ss:$0 sm:$0xff] }
  0x1e   : > { %v686_v3 = vpop.eup %685 }
  0x1f   : > { %v349_v4 = vmul.f32 32.0, %v686_v3  ;;  %vm353_vm1 = vweird.f32 %v686_v3 }
  0x21   : > { %v350_v5 = vsub.f32 1.0, %v349_v4 }
  0x23   : > { %v351_v6 = vmul.f32 %v686_v3, %v350_v5 }
  0x25   : > { %v352_v7 = vadd.f32 %v686_v3, %v351_v6 }
  0x27   : > { %v354_v8 = vsel %vm353_vm1, %v686_v3, %v352_v7 }
  0x8c   : > { %v347_v9 = vpop.xlane.xlu0 %346 }
  0x8d   : > { %v355_v10 = vmul.f32 %v354_v8, %v347_v9 }
  0x8f   : > { %v356_v11 = vsub.f32 %v341_v0, %v355_v10 }
  0x91   : > { %v357_v12 = vmul.f32 %v356_v11, %v356_v11  ;;  %v377_v36 = vmul.f32 %v683_v31, %v356_v11 }
  0x93   : > { %v358_v13 = vsel %vm344_vm0, %v357_v12, 0.0 }
  0x94   : > { %359 = vadd.xlane.f32.xlu0 %v358_v13 }
 0x107   : > { %v360_v14 = vpop.xlane.xlu0 %359 }
 0x108   : > { %v361_v15 = vmul.f32 0.032258064, %v360_v14 }
 0x10a   : > { %687 = vrsqrt.f32 %v361_v15  ;;  %vm369_vm2 = vcmp.eq.f32.partialorder %v361_v15, inf  ;;  %v372_v23 = vand.u32 2147483648, %v361_v15  ;;  %vm371_vm3 = vcmp.eq.f32.partialorder %v361_v15, 0.0 }
 0x110   : > { %v688_v16 = vpop.eup %687 }
 0x111   : > { %v363_v17 = vmul.f32 %v688_v16, %v361_v15 }
 0x113   : > { %v364_v18 = vmul.f32 %v688_v16, %v363_v17 }
 0x115   : > { %v365_v19 = vmul.f32 0.5, %v364_v18 }
 0x117   : > { %v366_v20 = vsub.f32 1.5, %v365_v19 }
 0x119   : > { %v367_v21 = vmul.f32 %v688_v16, %v366_v20 }
 0x11b   : > { %v368_v22 = vmul.f32 %v367_v21, %v361_v15 }
 0x11d   : > { %v370_v24 = vsel %vm369_vm2, %v361_v15, %v368_v22 }
 0x11e   : > { %v373_v25 = vsel %vm371_vm3, %v372_v23, %v370_v24 }
 0x11f   : > { %v378_v26 = vadd.f32 1e-06, %v373_v25 }
 0x121   : > { %689 = vrcp.f32 %v378_v26  ;;  %v390_v30 = vand.u32 2147483648, %v378_v26  ;;  %v388_v33 = vand.u32 2147483647, %v378_v26  ;;  %vm384_vm5 = vweird.f32 %v378_v26 }
 0x123   : > { %v391_v35 = vor.u32 1.1754944e-38, %v390_v30  ;;  %vm389_vm7 = vcmp.eq.f32.partialorder %v388_v33, 8.507059e+37 }
 0x127   : > { %v690_v27 = vpop.eup %689 }
 0x128   : > { %v380_v28 = vmul.f32 %v690_v27, %v378_v26  ;;  %vm385_vm4 = vweird.f32 %v690_v27 }
 0x129   : > { %vm386_vm6 = vmor %vm384_vm5, %vm385_vm4 }
 0x12a   : > { %v381_v29 = vsub.f32 1.0, %v380_v28 }
 0x12c   : > { %v382_v32 = vmul.f32 %v690_v27, %v381_v29 }
 0x12e   : > { %v383_v34 = vadd.f32 %v690_v27, %v382_v32 }
 0x130   : > { %v387_v38 = vsel %vm386_vm6, %v690_v27, %v383_v34 }
 0x131   : > { %v392_v39 = vsel %vm389_vm7, %v391_v35, %v387_v38 }
 0x132   : > { %v393_v40 = vmul.f32 %v392_v39, %v377_v36 }
 0x134   : > { %v397_v41 = vadd.f32 %v684_v37, %v393_v40 }
 0x136   : > { %398 = vst.msk [vmem:[#allocation2] sm:$0xff] %vm344_vm0, %v397_v41 }
 0x137 PF: > { %s636_s12 = sshll.u32 %s714_s24, 5  ;;  %s406_s16 = scalar_lea.vmem %s878_s4, %s714_s24  ;;  %vm411_vm8 = vcmask 261120   ;;  %vm435_vm9 = vcmask 64512  }
 0x138   : > { %s401_s20 = scalar_lea.vmem %s877_s3, %s636_s12  ;;  %v691_v47 = vld [vmem:[%s406_s16] ss:$0 sm:$0xff]  ;;  %s733_s24 = smov 120  }
 0x139   : > { %v405_v42 = vld [vmem:[%s401_s20 + $0x18] sm:$0xff]  ;;  %v404_v43 = vld [vmem:[%s401_s20 + $0x10] sm:$0xff]  ;;  %v403_v44 = vld [vmem:[%s401_s20 + $0x8] sm:$0xff]  ;;  %s734_s25 = smov 112  }
 0x13a   : > { %427 = vmatpush.msra.mxu0 %v405_v42  ;;  %v402_v45 = vld [vmem:[%s401_s20] sm:$0xff] }
 0x13c   : > { %428 = vmatpush.msra.mxu0 %v404_v43 }
 0x13d   : > { %v399_v46 = vld [vmem:[#allocation2] sm:$0xff] }
 0x13e   : > { %429 = vmatpush.msra.mxu0 %v403_v44 }
 0x140   : > { %430 = vmatpush.msra.mxu0 %v402_v45 }
 0x141   : > { %637 = vmatmul.msk.f32.vlgmr.msra.gmra.mxu0 %vm411_vm8, %v399_v46 }
 0x1be   : > { %v432_v48 = vpop.f32.mrf.mxu0 }
 0x1bf   : > { %v433_v49 = vadd.f32 %v691_v47, %v432_v48 }
 0x1c1   : > { %438 = vrot.lane.b32.xlu0 %v433_v49, %s733_s24  ;;  %436 = vst.msk [vmem:[%s320_s18] sm:$0xff] %vm435_vm9, %v433_v49 }
 0x1c9   : > { %442 = vrot.lane.b32.xlu0 %v433_v49, %s734_s25 }
 0x233   : > { %v439_v50 = vpop.permute.xlu0 %438 }
 0x234   : > { %441 = vst.msk [vmem:[%s328_s21] sm:$0xff] %vm435_vm9, %v439_v50 }
 0x23b   : > { %v443_v51 = vpop.permute.xlu0 %442 }
 0x23c   : > { %445 = vst.msk [vmem:[%s336_s10] sm:$0xff] %vm435_vm9, %v443_v51 }
 0x23d PF: > { %s18_s28 = sadd.s32 1, %s730_s28   ;;  %s882_s24 = smov %s722_s26 }
 0x23e   : > { %p15_p8 = scmp.ge.s32.totalorder %s18_s28, 10   ;;  %s883_s25 = smov %s726_s27 }
 0x23f   : > { %s884_s26 = smov %s887_s29  ;;  %s885_s27 = smov %s891_s30 }
 0x240   :  { %17 = sbr.rel (!%p15_p8) target bundleno = 3 (0x3), region = 100 }

// kernel: encoder_forward.11
= control target key start
LH: loop header
LB: loop body
LE: loop exit
PB: predicated region body
PF: predicated region fallthrough
CT: control target
= control target key end

     0   :  { %s603_s15 = smov 0   ;;  %s605_s16 = smov 0   ;;  %s669_s0 = inlined_call_operand.vmem [shape: f32[4,16,8], index: 0, kind: input, shape index: {}]   ;;  %s670_s1 = inlined_call_operand.vmem [shape: f32[4,8,32], index: 1, kind: input, shape index: {}]   ;;  %s671_s2 = inlined_call_operand.vmem [shape: f32[1,32], index: 2, kind: input, shape index: {}]   ;;  %s672_s3 = inlined_call_operand.vmem [shape: f32[16,32], index: 3, kind: input, shape index: {}]   ;;  %s673_s4 = inlined_call_operand.vmem [shape: f32[16,32], index: 4, kind: output, shape index: {}]  }
   0x1   :  { %s607_s17 = smov 0   ;;  %s609_s18 = smov 0  }
   0x2   :  { %s611_s19 = smov 0  }
   0x3 LB: > { %s26_s20 = sadd.s32 1, %s567_s17  ;;  %s33_s21 = sadd.s32 1, %s571_s18  ;;  %s575_s19 = sphi %s611_s19, %s14_s19   ;;  %s571_s18 = sphi %s609_s18, %s677_s18   ;;  %s567_s17 = sphi %s607_s17, %s676_s17   ;;  %s563_s16 = sphi %s605_s16, %s675_s16   ;;  %s559_s15 = sphi %s603_s15, %s674_s15  }
   0x4   : > { %p27_p0 = scmp.ge.s32.totalorder %s26_s20, 4  ;;  %p484_p1 = scmp.ge.s32.totalorder %s575_s19, 1 }
   0x5   : > { %p224_p2 = scmp.lt.s32.totalorder %s575_s19, 9 }
   0x6   : > { %s679_s20 = smov (%p27_p0, %s26_s20), 0  ;;  %s681_s21 = smov (!%p27_p0, %s33_s21), %s571_s18 }
   0x7   : > { %p225_p3 = pnand %p484_p1, %p224_p2  ;;  %p35_p4 = scmp.ge.s32.totalorder %s681_s21, 2 }
   0x8   : > { %p272_p5 = scmp.lt.s32.totalorder (!%p225_p3), %s559_s15, 3  ;;  %p274_p6 = scmp.lt.s32.totalorder (!%p225_p3), %s563_s16, 1 }
   0x9   : > { %s683_s21 = smov (%p35_p4, %s681_s21), 0  ;;  %228 = sbr.rel (%p225_p3) target bundleno = 170 (0xaa), region = 36 }
   0xa   : > { %p490_p7 = scmp.ne.s32.totalorder (!%p225_p3), %s559_s15, 0 }
   0xe   : > { %s273_s22 = scalar_select %p272_p5, %s559_s15, 3 }
   0xf   : > { %s685_s16 = smov (!%p274_p6, %s563_s16), 1 }
  0x10   : > { %s485_s23 = sshll.u32 %s273_s22, 1  ;;  %s487_s24 = sshll.u32 %s273_s22, 3 }
  0x11   : > { %s277_s25 = sadd.s32 %s485_s23, %s685_s16  ;;  %s286_s28 = scalar_lea.vmem %s670_s1, %s487_s24 }
  0x12   : > { %s486_s29 = sshll.u32 %s277_s25, 3  ;;  %s488_s30 = sshll.u32 %s685_s16, 3 }
  0x13   : > { %s279_s7 = scalar_lea.vmem %s669_s0, %s486_s29  ;;  %s296_s10 = scalar_lea.vmem %s672_s3, %s488_s30 }
  0x14   : > { %s303_s13 = scalar_lea.vmem %s673_s4, %s488_s30  ;;  %307 = sbr.rel (%p490_p7) target bundleno = 27 (0x1b), region = 40 }
  0x19   : > { %vm308_vm0 = vcmask 261120   ;;  %v577_v0 = vmov 0.0  }
  0x1a   : > { %309 = vst.msk [vmem:[#allocation2] sm:$0xff] %vm308_vm0, %v577_v0 }
  0x1b PF: > { %v312_v1 = vld [vmem:[%s286_s28] sm:$0xff]  ;;  %vm313_vm1 = vcmask 64512   ;;  %vm338_vm2 = vcmask 261120   ;;  %p492_p8 = scmp.ne.s32.totalorder %s559_s15, 3 }
  0x1c   : > { %v311_v2 = vld [vmem:[%s279_s7] sm:$0xff]  ;;  %332 = vmatpush.msra.mxu0 %v312_v1 }
  0x1d   : > { %491 = vmatmul.msk.f32.vlgmr.msra.gmra.mxu0 %vm313_vm1, %v311_v2 }
  0x21   : > { %v310_v3 = vld [vmem:[#allocation2] sm:$0xff] }
  0x99   : > { %343 = sbr.rel (%p492_p8) target bundleno = 170 (0xaa), region = 44 }
  0x9a   : > { %v334_v4 = vpop.f32.mrf.mxu0 }
  0x9b   : > { %v337_v5 = vadd.f32 %v334_v4, %v310_v3 }
  0x9d   : > { %339 = vst.msk [vmem:[#allocation2] sm:$0xff] %vm338_vm2, %v337_v5 }
  0x9e   : > { %v536_v7 = vld [vmem:[%s671_s2] ss:$0 sm:$0xff] }
  0x9f   : > { %v350_v8 = vld [vmem:[%s296_s10] sm:$0xff] }
  0xa4   : > { %v344_v6 = vld [vmem:[#allocation2] sm:$0xff] }
  0xa5   : > { %v349_v9 = vadd.f32 %v536_v7, %v344_v6 }
  0xa7   : > { %v351_v10 = vadd.f32 %v350_v8, %v349_v9 }
  0xa9   : > { %352 = vst.msk [vmem:[%s303_s13] sm:$0xff] %vm338_vm2, %v351_v10 }
  0xaa PF: > { %s14_s19 = sadd.s32 1, %s575_s19   ;;  %s674_s15 = smov %s567_s17 }
  0xab   : > { %p11_p9 = scmp.ge.s32.totalorder %s14_s19, 10   ;;  %s675_s16 = smov %s571_s18 }
  0xac   : > { %s676_s17 = smov %s679_s20  ;;  %s677_s18 = smov %s683_s21 }
  0xad   :  { %13 = sbr.rel (!%p11_p9) target bundleno = 3 (0x3), region = 83 }

// kernel: encoder_forward.12
= control target key start
LH: loop header
LB: loop body
LE: loop exit
PB: predicated region body
PF: predicated region fallthrough
CT: control target
= control target key end

     0   :  { %s703_s24 = smov 0   ;;  %s705_s25 = smov 0   ;;  %s803_s0 = inlined_call_operand.vmem [shape: f32[16,32], index: 0, kind: input, shape index: {}]   ;;  %s804_s1 = inlined_call_operand.vmem [shape: f32[1,32], index: 1, kind: input, shape index: {}]   ;;  %s805_s2 = inlined_call_operand.vmem [shape: f32[1,32], index: 2, kind: input, shape index: {}]   ;;  %s806_s3 = inlined_call_operand.vmem [shape: f32[32,64], index: 3, kind: input, shape index: {}]   ;;  %s807_s4 = inlined_call_operand.vmem [shape: f32[1,64], index: 4, kind: input, shape index: {}]   ;;  %s808_s5 = inlined_call_operand.vmem [shape: f32[64,32], index: 5, kind: input, shape index: {}]   ;;  %s809_s6 = inlined_call_operand.vmem [shape: f32[1,32], index: 6, kind: input, shape index: {}]   ;;  %s810_s7 = inlined_call_operand.vmem [shape: f32[16,32], index: 7, kind: output, shape index: {}]  }
   0x1   :  { %s707_s26 = smov 0  }
   0x2 LB: > { %s29_s27 = sadd.s32 1, %s655_s25  ;;  %p594_p0 = scmp.ge.s32.totalorder %s659_s26, 1  ;;  %s659_s26 = sphi %s707_s26, %s17_s26   ;;  %s655_s25 = sphi %s705_s25, %s812_s25   ;;  %s651_s24 = sphi %s703_s24, %s811_s24  }
   0x3   : > { %p31_p1 = scmp.ge.s32.totalorder %s29_s27, 2  ;;  %p276_p2 = scmp.lt.s32.totalorder %s659_s26, 3 }
   0x5   : > { %s814_s27 = smov (%p31_p1, %s29_s27), 0  ;;  %p277_p3 = pnand %p594_p0, %p276_p2 }
   0x6   : > { %p318_p4 = scmp.lt.s32.totalorder (!%p277_p3), %s651_s24, 1 }
   0x7   : > { %280 = sbr.rel (%p277_p3) target bundleno = 581 (0x245), region = 48 }
   0xc   : > { %s816_s24 = smov (!%p318_p4, %s651_s24), 1  ;;  %vm346_vm0 = vcmask 261120   ;;  %v661_v2 = vmov 32.0   ;;  %v406_v16 = vld [vmem:[%s806_s3 + $0x18] sm:$0xff]  ;;  %v405_v17 = vld [vmem:[%s806_s3 + $0x10] sm:$0xff]  ;;  %v404_v19 = vld [vmem:[%s806_s3 + $0x8] sm:$0xff] }
   0xd   : > { %s595_s28 = sshll.u32 %s816_s24, 3  ;;  %631 = vrcp.f32 %v661_v2  ;;  %427 = vmatpush.msra.mxu0 %v406_v16  ;;  %v403_v21 = vld [vmem:[%s806_s3] sm:$0xff]  ;;  %v444_v30 = vld [vmem:[%s808_s5 + $0x38] sm:$0xff]  ;;  %v443_v31 = vld [vmem:[%s808_s5 + $0x30] sm:$0xff]  ;;  %v662_v55 = vmov 0.0   ;;  %vm445_vm8 = vcmask 523264  }
   0xe   : > { %s321_s8 = scalar_lea.vmem %s803_s0, %s595_s28  ;;  %457 = vmatpush.msra.mxu1 %v444_v30  ;;  %v442_v33 = vld [vmem:[%s808_s5 + $0x28] sm:$0xff]  ;;  %v441_v34 = vld [vmem:[%s808_s5 + $0x20] sm:$0xff]  ;;  %v440_v35 = vld [vmem:[%s808_s5 + $0x18] sm:$0xff]  ;;  %401 = vst.msk [vmem:[#allocation3] sm:$0xff] %vm346_vm0, %v662_v55  ;;  %s338_s30 = scalar_lea.vmem %s810_s7, %s595_s28 }
   0xf   : > { %v729_v0 = vld [vmem:[%s321_s8] sm:$0xff]  ;;  %428 = vmatpush.msra.mxu0 %v405_v17  ;;  %v439_v52 = vld [vmem:[%s808_s5 + $0x10] sm:$0xff]  ;;  %v438_v53 = vld [vmem:[%s808_s5 + $0x8] sm:$0xff] }
  0x10   : > { %v347_v1 = vsel %vm346_vm0, %v729_v0, 0.0  ;;  %458 = vmatpush.msra.mxu1 %v443_v31  ;;  %v627_v40 = vld [vmem:[%s804_s1] ss:$0 sm:$0xff] }
  0x11   : > { %348 = vadd.xlane.f32.xlu0 %v347_v1  ;;  %429 = vmatpush.msra.mxu0 %v404_v19  ;;  %v628_v47 = vld [vmem:[%s805_s2] ss:$0 sm:$0xff] }
  0x12   : > { %459 = vmatpush.msra.mxu1 %v442_v33  ;;  %v437_v54 = vld [vmem:[%s808_s5] sm:$0xff] }
  0x13   : > { %v632_v3 = vpop.eup %631  ;;  %430 = vmatpush.msra.mxu0 %v403_v21  ;;  %v629_v56 = vld [vmem:[%s807_s4] ss:$0 sm:$0xff] }
  0x14   : > { %v351_v4 = vmul.f32 32.0, %v632_v3  ;;  %vm355_vm1 = vweird.f32 %v632_v3  ;;  %460 = vmatpush.msra.mxu1 %v441_v34  ;;  %v630_v63 = vld [vmem:[%s809_s6] ss:$0 sm:$0xff] }
  0x15   : > { %v436_v60 = vld [vmem:[#allocation3] sm:$0xff] }
  0x16   : > { %v352_v5 = vsub.f32 1.0, %v351_v4  ;;  %461 = vmatpush.msra.mxu1 %v440_v35 }
  0x18   : > { %v353_v6 = vmul.f32 %v632_v3, %v352_v5  ;;  %462 = vmatpush.msra.mxu1 %v439_v52 }
  0x1a   : > { %v354_v7 = vadd.f32 %v632_v3, %v353_v6  ;;  %463 = vmatpush.msra.mxu1 %v438_v53 }
  0x1c   : > { %v356_v8 = vsel %vm355_vm1, %v632_v3, %v354_v7  ;;  %464 = vmatpush.msra.mxu1 %v437_v54 }
  0x84   : > { %v349_v9 = vpop.xlane.xlu0 %348 }
  0x85   : > { %v357_v10 = vmul.f32 %v356_v8, %v349_v9 }
  0x87   : > { %v358_v11 = vsub.f32 %v729_v0, %v357_v10 }
  0x89   : > { %v359_v12 = vmul.f32 %v358_v11, %v358_v11  ;;  %v379_v45 = vmul.f32 %v627_v40, %v358_v11 }
  0x8b   : > { %v360_v13 = vsel %vm346_vm0, %v359_v12, 0.0 }
  0x8c   : > { %361 = vadd.xlane.f32.xlu0 %v360_v13 }
  0xff   : > { %v362_v14 = vpop.xlane.xlu0 %361 }
 0x100   : > { %v363_v15 = vmul.f32 0.032258064, %v362_v14 }
 0x102   : > { %633 = vrsqrt.f32 %v363_v15  ;;  %vm371_vm2 = vcmp.eq.f32.partialorder %v363_v15, inf  ;;  %v374_v27 = vand.u32 2147483648, %v363_v15  ;;  %vm373_vm3 = vcmp.eq.f32.partialorder %v363_v15, 0.0 }
 0x108   : > { %v634_v18 = vpop.eup %633 }
 0x109   : > { %v365_v20 = vmul.f32 %v634_v18, %v363_v15 }
 0x10b   : > { %v366_v22 = vmul.f32 %v634_v18, %v365_v20 }
 0x10d   : > { %v367_v23 = vmul.f32 0.5, %v366_v22 }
 0x10f   : > { %v368_v24 = vsub.f32 1.5, %v367_v23 }
 0x111   : > { %v369_v25 = vmul.f32 %v634_v18, %v368_v24 }
 0x113   : > { %v370_v26 = vmul.f32 %v369_v25, %v363_v15 }
 0x115   : > { %v372_v28 = vsel %vm371_vm2, %v363_v15, %v370_v26 }
 0x116   : > { %v375_v29 = vsel %vm373_vm3, %v374_v27, %v372_v28 }
 0x117   : > { %v380_v32 = vadd.f32 1e-06, %v375_v29 }
 0x119   : > { %635 = vrcp.f32 %v380_v32  ;;  %v392_v39 = vand.u32 2147483648, %v380_v32  ;;  %v390_v42 = vand.u32 2147483647, %v380_v32  ;;  %vm386_vm5 = vweird.f32 %v380_v32 }
 0x11b   : > { %v393_v44 = vor.u32 1.1754944e-38, %v392_v39  ;;  %vm391_vm7 = vcmp.eq.f32.partialorder %v390_v42, 8.507059e+37 }
 0x11f   : > { %v636_v36 = vpop.eup %635 }
 0x120   : > { %v382_v37 = vmul.f32 %v636_v36, %v380_v32  ;;  %vm387_vm4 = vweird.f32 %v636_v36 }
 0x121   : > { %vm388_vm6 = vmor %vm386_vm5, %vm387_vm4 }
 0x122   : > { %v383_v38 = vsub.f32 1.0, %v382_v37 }
 0x124   : > { %v384_v41 = vmul.f32 %v636_v36, %v383_v38 }
 0x126   : > { %v385_v43 = vadd.f32 %v636_v36, %v384_v41 }
 0x128   : > { %v389_v46 = vsel %vm388_vm6, %v636_v36, %v385_v43 }
 0x129   : > { %v394_v48 = vsel %vm391_vm7, %v393_v44, %v389_v46 }
 0x12a   : > { %v395_v49 = vmul.f32 %v394_v48, %v379_v45 }
 0x12c   : > { %v399_v50 = vadd.f32 %v628_v47, %v395_v49 }
 0x12e   : > { %400 = vst.msk [vmem:[#allocation2] sm:$0xff] %vm346_vm0, %v399_v50 }
 0x135   : > { %v402_v51 = vld [vmem:[#allocation2] sm:$0xff] }
 0x136   : > { %597 = vmatmul.msk.f32.vlgmr.msra.gmra.mxu0 %vm346_vm0, %v402_v51 }
 0x1b3   : > { %v432_v57 = vpop.f32.mrf.mxu0 }
 0x1b4   : > { %v433_v58 = vadd.f32 %v629_v56, %v432_v57 }
 0x1b6   : > { %v435_v59 = vmax.f32 %v433_v58, 0.0 }
 0x1b8   : > { %598 = vmatmul.msk.f32.vlgmr.msra.gmra.mxu1 %vm445_vm8, %v435_v59 }
 0x235   : > { %v466_v61 = vpop.f32.mrf.mxu1 }
 0x236   : > { %v469_v62 = vadd.f32 %v466_v61, %v436_v60 }
 0x238   : > { %470 = vst.msk [vmem:[#allocation3] sm:$0xff] %vm346_vm0, %v469_v62 }
 0x23f   : > { %v475_v1 = vld [vmem:[#allocation3] sm:$0xff] }
 0x240   : > { %v476_v2 = vadd.f32 %v475_v1, %v729_v0 }
 0x242   : > { %v481_v3 = vadd.f32 %v630_v63, %v476_v2 }
 0x244   : > { %482 = vst.msk [vmem:[%s338_s30] sm:$0xff] %vm346_vm0, %v481_v3 }
 0x245 PF: > { %s17_s26 = sadd.s32 1, %s659_s26   ;;  %s811_s24 = smov %s655_s25 }
 0x246   : > { %p14_p5 = scmp.ge.s32.totalorder %s17_s26, 4   ;;  %s812_s25 = smov %s814_s27 }
 0x248   :  { %16 = sbr.rel (!%p14_p5) target bundleno = 2 (0x2), region = 95 }

// kernel: encoder_forward.17
= control target key start
LH: loop header
LB: loop body
LE: loop exit
PB: predicated region body
PF: predicated region fallthrough
CT: control target
= control target key end

     0   :  { %8 = vsyncpa [#allocation3], 0  ;;  %s536_s0 = inlined_call_operand.vmem [shape: f32[16,32], index: 0, kind: input, shape index: {}]   ;;  %s537_s1 = inlined_call_operand.vmem [shape: f32[1,32], index: 1, kind: input, shape index: {}]   ;;  %s538_s2 = inlined_call_operand.vmem [shape: f32[1,32], index: 2, kind: input, shape index: {}]   ;;  %s539_s3 = inlined_call_operand.hbm [shape: f32[16,32], index: 3, kind: output, shape index: {}]  }
   0x1   :  { %10 = vsyncpa [#allocation3 + $0x1], 0  ;;  %s442_s12 = smov 0   ;;  %s444_s13 = smov 0  }
   0x2   :  { %s446_s14 = smov 0   ;;  %s448_s15 = smov 0  }
   0x3 LB: > { %s463_s16 = sadd.s32 4294967295, %s419_s15   ;;  %s299_s17 = sadd.s32 4294967294, %s419_s15   ;;  %s419_s15 = sphi %s448_s15, %s545_s15   ;;  %s415_s14 = sphi %s446_s14, %s544_s14   ;;  %s411_s13 = sphi %s444_s13, %s543_s13   ;;  %s407_s12 = sphi %s442_s12, %s542_s12  }
   0x4   : > { %s467_s18 = sadd.s32 1, %s419_s15   ;;  %s91_s19 = sadd.s32 1, %s415_s14 }
   0x5   : > { %s88_s20 = ssub.s32 %s419_s15, %s467_s18  ;;  %p101_p0 = scmp.ne.s32.totalorder %s415_s14, %s411_s13 }
   0x6   : > { %p89_p1 = scmp.eq.s32.totalorder %s88_s20, 0  ;;  %p102_p2 = scmp.eq.s32.totalorder %s463_s16, 1 }
   0x7   : > { %p107_p3 = scmp.ne.s32.totalorder %s411_s13, %s407_s12  ;;  %p108_p4 = scmp.eq.s32.totalorder %s299_s17, 1 }
   0x8   : > { %s478_s21 = scalar_select %p89_p1, %s415_s14, %s91_s19  }
   0x9   : > { %p480_p5 = por %p102_p2, %p101_p0  ;;  %p484_p6 = por %p108_p4, %p107_p3 }
   0xa   : > { %p302_p7 = scmp.ge.s32.totalorder %s419_s15, 1  ;;  %p139_p8 = scmp.lt.s32.totalorder %s419_s15, 3 }
   0xc   : > { %p140_p9 = pnand %p302_p7, %p139_p8 }
   0xd   : > { %p162_p10 = scmp.lt.s32.totalorder (!%p140_p9), %s463_s16, 1  ;;  %s159_s29 = sand.u32 (!%p140_p9), 1, %s411_s13  }
   0xe   : > { %143 = sbr.rel (%p140_p9) target bundleno = 313 (0x139), region = 32  ;;  %s303_s30 = sshll.u32 (!%p140_p9), %s159_s29, 3 }
   0xf   : > { %s306_s4 = sshll.u32 (!%p140_p9), %s463_s16, 3  ;;  %s225_s20 = scalar_lea.sflag (!%p140_p9), [#allocation3], %s159_s29 }
  0x10   : > { %s235_s9 = scalar_lea.hbm (!%p140_p9), %s539_s3, %s306_s4 }
  0x11   : > { %s239_s19 = sshll.u32 (!%p140_p9), %s235_s9, 4  ;;  %s240_s19 = int_to_ptr.hbm [resolvable:$true] %s239_s19 }
  0x13   : > { %s163_s24 = scalar_select %p162_p10, %s463_s16, 1  ;;  %vm169_vm0 = vcmask 261120   ;;  %v421_v2 = vmov 32.0   ;;  %v349_v31 = vld [vmem:[%s537_s1] ss:$0 sm:$0xff] }
  0x14   : > { %351 = vrcp.f32 %v421_v2  ;;  %v350_v38 = vld [vmem:[%s538_s2] ss:$0 sm:$0xff]  ;;  %s161_s16 = scalar_lea.vmem [#allocation2], %s303_s30 }
  0x15   : > { %s304_s25 = sshll.u32 %s163_s24, 3  ;;  %s237_s17 = sshll.u32 %s161_s16, 4  ;;  %s238_s17 = int_to_ptr.vmem [resolvable:$true] %s237_s17 }
  0x16   : > { %s165_s28 = scalar_lea.vmem %s536_s0, %s304_s25  ;;  %s371_s24 = sshra.s32 %s240_s19, 4  ;;  %s372_s24 = int_to_ptr.hbm [resolvable:$true] %s371_s24 }
  0x17   : > { %v166_v0 = vld [vmem:[%s165_s28] sm:$0xff]  ;;  %s373_s25 = scalar_lea.hbm %s372_s24, 8  ;;  %s377_s28 = scalar_lea.hbm %s539_s3, 16 }
  0x18   : > { %v170_v1 = vsel %vm169_vm0, %v166_v0, 0.0  ;;  %p374_p11 = scmp.ne.s32.totalorder %s372_s24, %s373_s25  ;;  %p378_p0 = scmp.lt.s32.totalorder %s372_s24, %s539_s3 }
  0x19   : > { %171 = vadd.xlane.f32.xlu0 %v170_v1  ;;  %p379_p1 = scmp.lt.s32.totalorder %s377_s28, %s373_s25 }
  0x1a   : > { %v352_v3 = vpop.eup %351  ;;  %p375_p12 = pnand %p374_p11, %p480_p5 }
  0x1b   : > { %v174_v4 = vmul.f32 32.0, %v352_v3  ;;  %vm178_vm1 = vweird.f32 %v352_v3  ;;  %p380_p2 = por %p379_p1, %p378_p0 }
  0x1c   : > { %p376_p13 = pneg %p375_p12 }
  0x1d   : > { %v175_v5 = vsub.f32 1.0, %v174_v4 }
  0x1e   : > { %p381_p3 = pnand %p380_p2, %p376_p13 }
  0x1f   : > { %v176_v6 = vmul.f32 %v352_v3, %v175_v5 }
  0x21   : > { %v177_v7 = vadd.f32 %v352_v3, %v176_v6 }
  0x23   : > { %v179_v8 = vsel %vm178_vm1, %v352_v3, %v177_v7 }
  0x8c   : > { %v172_v9 = vpop.xlane.xlu0 %171 }
  0x8d   : > { %v180_v10 = vmul.f32 %v179_v8, %v172_v9 }
  0x8f   : > { %v181_v11 = vsub.f32 %v166_v0, %v180_v10 }
  0x91   : > { %v182_v12 = vmul.f32 %v181_v11, %v181_v11  ;;  %v202_v36 = vmul.f32 %v349_v31, %v181_v11 }
  0x93   : > { %v183_v13 = vsel %vm169_vm0, %v182_v12, 0.0 }
  0x94   : > { %184 = vadd.xlane.f32.xlu0 %v183_v13 }
 0x107   : > { %v185_v14 = vpop.xlane.xlu0 %184 }
 0x108   : > { %v186_v15 = vmul.f32 0.032258064, %v185_v14 }
 0x10a   : > { %353 = vrsqrt.f32 %v186_v15  ;;  %vm194_vm2 = vcmp.eq.f32.partialorder %v186_v15, inf  ;;  %v197_v23 = vand.u32 2147483648, %v186_v15  ;;  %vm196_vm3 = vcmp.eq.f32.partialorder %v186_v15, 0.0 }
 0x110   : > { %v354_v16 = vpop.eup %353 }
 0x111   : > { %v188_v17 = vmul.f32 %v354_v16, %v186_v15 }
 0x113   : > { %v189_v18 = vmul.f32 %v354_v16, %v188_v17 }
 0x115   : > { %v190_v19 = vmul.f32 0.5, %v189_v18 }
 0x117   : > { %v191_v20 = vsub.f32 1.5, %v190_v19 }
 0x119   : > { %v192_v21 = vmul.f32 %v354_v16, %v191_v20 }
 0x11b   : > { %v193_v22 = vmul.f32 %v192_v21, %v186_v15 }
 0x11d   : > { %v195_v24 = vsel %vm194_vm2, %v186_v15, %v193_v22 }
 0x11e   : > { %v198_v25 = vsel %vm196_vm3, %v197_v23, %v195_v24 }
 0x11f   : > { %v203_v26 = vadd.f32 1e-06, %v198_v25 }
 0x121   : > { %355 = vrcp.f32 %v203_v26  ;;  %v215_v30 = vand.u32 2147483648, %v203_v26  ;;  %v213_v33 = vand.u32 2147483647, %v203_v26  ;;  %vm209_vm5 = vweird.f32 %v203_v26 }
 0x123   : > { %v216_v35 = vor.u32 1.1754944e-38, %v215_v30  ;;  %vm214_vm7 = vcmp.eq.f32.partialorder %v213_v33, 8.507059e+37 }
 0x127   : > { %v356_v27 = vpop.eup %355 }
 0x128   : > { %v205_v28 = vmul.f32 %v356_v27, %v203_v26  ;;  %vm210_vm4 = vweird.f32 %v356_v27 }
 0x129   : > { %vm211_vm6 = vmor %vm209_vm5, %vm210_vm4 }
 0x12a   : > { %v206_v29 = vsub.f32 1.0, %v205_v28 }
 0x12c   : > { %v207_v32 = vmul.f32 %v356_v27, %v206_v29 }
 0x12e   : > { %v208_v34 = vadd.f32 %v356_v27, %v207_v32 }
 0x130   : > { %v212_v37 = vsel %vm211_vm6, %v356_v27, %v208_v34 }
 0x131   : > { %v217_v39 = vsel %vm214_vm7, %v216_v35, %v212_v37 }
 0x132   : > { %v218_v40 = vmul.f32 %v217_v39, %v202_v36 }
 0x134   : > { %v222_v41 = vadd.f32 %v350_v38, %v218_v40 }
 0x136   : > { %223 = vst.msk [vmem:[%s161_s16] sm:$0xff] %vm169_vm0, %v222_v41 }
 0x137   : > { %384 = shalt.err (!%p381_p3)
}
 0x138   : > { %309 = dma.vmem_to_hbm [thread:$0]  (%p480_p5), %s238_s17, 128, %s240_s19, %s225_s20  }
 0x139 PF: > { %p315_p4 = scmp.ge.s32.totalorder %s419_s15, 2  ;;  %s251_s29 = sand.u32 1, %s407_s12  }
 0x13a   : > { %s252_s5 = scalar_lea.sflag [#allocation3], %s251_s29 }
 0x13b   : > { %p312_p7 = pnand %p315_p4, %p484_p6 }
 0x13d   : > { %p313_p8 = pneg %p312_p7 }
 0x13f   : > { %402 = dma.done.wait (%p313_p8), %s252_s5, 128  }
 0x140   : > { %404 = vsyncadd (%p313_p8), %s252_s5, 4294967168  ;;  %p13_p9 = scmp.ge.s32.totalorder %s467_s18, 4   ;;  %s542_s12 = smov %s411_s13 }
 0x141   : > { %s543_s13 = smov %s415_s14  ;;  %s544_s14 = smov %s478_s21 }
 0x142   : > { %s545_s15 = smov %s467_s18  ;;  %15 = sbr.rel (!%p13_p9) target bundleno = 3 (0x3), region = 67 }
 0x147   :  { %258 = vsyncpa [#allocation3], 1 }
 0x148   :  { %260 = vsyncpa [#allocation3 + $0x1], 1 }

</bundles_post_ra>
